<compile_context>
chip_gen: v7x
topology: tpu7x:2x2x1
jax: 0.10.0
libtpu: 0.0.40
codegen_flags: <defaults>
</compile_context>

<pallas_src>
import math
import jax
import jax.numpy as jnp
from jax.experimental import pallas as pl
from jax.experimental.pallas import tpu as pltpu


# ---------------- TrajParamIndex (assumed) ----------------
X, Y, Z = 0, 1, 2
LENGTH, WIDTH, HEIGHT = 3, 4, 5
VX, VY = 6, 7
COS_YAW, SIN_YAW = 8, 9
END_OF_INDEX = 10

LN_EPS = 1e-5


# ---------------- Pallas kernel (factory: closes over static group layout) ----------------
def _make_kernel(group_slices):
    """group_slices: tuple of (lane_offset, lane_size) for the pos/dim/ori/vel groups."""

    def kernel(x_ref, w1_ref, wslab_ref, bias_ref, out_ref):
        E = out_ref.shape[-1]
        wdt = wslab_ref.dtype

        # bias/affine slab: one vreg worth of data, read once.
        bias = bias_ref[...]                      # (8, E) f32
        b1, b2 = bias[0:1, :], bias[1:2, :]
        bf1, bf2 = bias[2:3, :], bias[3:4, :]
        g_out, be_out = bias[4:5, :], bias[5:6, :]

        # lane-group masks for the segmented (per-slice-MLP) LayerNorm.
        lane = jax.lax.broadcasted_iota(jnp.int32, (1, E), 1)
        masks, inv_n = [], []
        for (o, s) in group_slices:
            masks.append(((lane >= o) & (lane < o + s)).astype(jnp.float32))
            inv_n.append(1.0 / float(s))

        def seg_ln(h):
            # 4 independent LayerNorms over contiguous lane groups, no affine
            # (affines were folded into the following Linear at param-prep time).
            mu = jnp.zeros_like(h)
            for m, inv in zip(masks, inv_n):
                mu = mu + (jnp.sum(h * m, axis=-1, keepdims=True) * inv) * m
            c = h - mu
            cc = c * c
            rstd = jnp.zeros_like(h)
            for m, inv in zip(masks, inv_n):
                v = jnp.sum(cc * m, axis=-1, keepdims=True) * inv
                rstd = rstd + jax.lax.rsqrt(v + LN_EPS) * m
            return c * rstd

        def full_ln(h):
            mu = jnp.mean(h, axis=-1, keepdims=True)
            c = h - mu
            v = jnp.mean(c * c, axis=-1, keepdims=True)
            return c * jax.lax.rsqrt(v + LN_EPS)

        def lin(h, w, b):
            # weights are read at the point of use; accumulate in f32.
            return jnp.dot(h.astype(wdt), w, preferred_element_type=jnp.float32) + b

        x = x_ref[...]                                            # (tile, T) f32

        # slice MLPs, first Linear: packed block-structured (T, E) weight
        # -> output lanes already laid out as [pos | dim | ori | vel].
        h = jnp.maximum(lin(x, w1_ref[...], b1), 0.0)
        h = seg_ln(h)
        # slice MLPs, second Linear: (E, E) block-diagonal (LN1 affines pre-folded).
        h = jnp.maximum(lin(h, wslab_ref[0:E, :], b2), 0.0)
        h = seg_ln(h)
        # fusion Linear 1 (slice LN2 affines pre-folded); concat is implicit in lane layout.
        h = jnp.maximum(lin(h, wslab_ref[E:2 * E, :], bf1), 0.0)
        h = full_ln(h)
        # fusion Linear 2 (fusion LN1 affine pre-folded).
        h = jnp.maximum(lin(h, wslab_ref[2 * E:3 * E, :], bf2), 0.0)
        out_ref[...] = (full_ln(h) * g_out + be_out).astype(out_ref.dtype)

    return kernel


# ---------------- parameter construction (mirrors the torch module init) ----------------
def make_embed_params(key, in_dim, out_dim):
    """Linear-ReLU-LN-Linear-ReLU-LN params; xavier_normal matrices, torch-default
    biases, LayerNorm gamma=1 / beta=0 (init_weights only touches dim>1 params)."""
    k1, k2, k3, k4 = jax.random.split(key, 4)
    std1 = math.sqrt(2.0 / (in_dim + out_dim))
    std2 = math.sqrt(2.0 / (out_dim + out_dim))
    return dict(
        w1=jax.random.normal(k1, (in_dim, out_dim), jnp.float32) * std1,
        b1=jax.random.uniform(k3, (out_dim,), jnp.float32, -1.0, 1.0) / math.sqrt(in_dim),
        g1=jnp.ones((out_dim,), jnp.float32),
        be1=jnp.zeros((out_dim,), jnp.float32),
        w2=jax.random.normal(k2, (out_dim, out_dim), jnp.float32) * std2,
        b2=jax.random.uniform(k4, (out_dim,), jnp.float32, -1.0, 1.0) / math.sqrt(out_dim),
        g2=jnp.ones((out_dim,), jnp.float32),
        be2=jnp.zeros((out_dim,), jnp.float32),
    )


def pack_params(pos_p, dim_p, ori_p, vel_p, fus_p, weight_dtype=jnp.float32):
    """Fold LN affines into the following Linear and pack everything into 3 arrays."""
    groups = [pos_p, dim_p, ori_p, vel_p]
    # input traj-column ranges for each slice MLP (concat order: pos, dim, ori, vel)
    in_slices = [(X, Z + 1), (LENGTH, HEIGHT + 1), (COS_YAW, SIN_YAW + 1), (VX, VY + 1)]

    sizes = [int(p["w1"].shape[1]) for p in groups]
    E = sum(sizes)
    T = END_OF_INDEX
    offsets, o = [], 0
    for s in sizes:
        offsets.append(o)
        o += s

    w1p = jnp.zeros((T, E), jnp.float32)
    b1p = jnp.zeros((E,), jnp.float32)
    w2bd = jnp.zeros((E, E), jnp.float32)
    b2p = jnp.zeros((E,), jnp.float32)
    gcat = jnp.zeros((E,), jnp.float32)
    becat = jnp.zeros((E,), jnp.float32)

    for p, (c0, c1), off, sz in zip(groups, in_slices, offsets, sizes):
        w1p = w1p.at[c0:c1, off:off + sz].set(p["w1"])
        b1p = b1p.at[off:off + sz].set(p["b1"])
        # fold LN1 affine (g1, be1) of this slice MLP into its second Linear
        w2f = p["g1"][:, None] * p["w2"]
        b2f = p["be1"] @ p["w2"] + p["b2"]
        w2bd = w2bd.at[off:off + sz, off:off + sz].set(w2f)
        b2p = b2p.at[off:off + sz].set(b2f)
        gcat = gcat.at[off:off + sz].set(p["g2"])
        becat = becat.at[off:off + sz].set(p["be2"])

    # fold the slice MLPs' final LN affine into the fusion first Linear
    wf1 = gcat[:, None] * fus_p["w1"]
    bf1 = becat @ fus_p["w1"] + fus_p["b1"]
    # fold the fusion LN1 affine into the fusion second Linear
    wf2 = fus_p["g1"][:, None] * fus_p["w2"]
    bf2 = fus_p["be1"] @ fus_p["w2"] + fus_p["b2"]

    wslab = jnp.concatenate([w2bd, wf1, wf2], axis=0).astype(weight_dtype)  # (3E, E)
    w1p = w1p.astype(weight_dtype)

    bias = jnp.zeros((8, E), jnp.float32)  # sublane-padded bias/affine slab
    bias = bias.at[0].set(b1p).at[1].set(b2p).at[2].set(bf1).at[3].set(bf2)
    bias = bias.at[4].set(fus_p["g2"]).at[5].set(fus_p["be2"])

    group_slices = tuple(zip(offsets, sizes))
    return w1p, wslab, bias, group_slices


# ---------------- wrapper ----------------
def _choose_tile(rows):
    # Biggest tile that still gives >= 2 grid steps (keeps both v7x TCs busy);
    # all candidates are multiples of 8 and tiny vs. any generation's VMEM.
    for cand in (1024, 512, 256, 128, 64, 32, 16, 8):
        if rows >= 2 * cand:
            return cand
    return 8


def anchor_encoder_forward(trajs, packed):
    w1p, wslab, bias, group_slices = packed
    B, N, T = trajs.shape
    E = int(w1p.shape[1])
    rows = B * N
    x = trajs.reshape(rows, T).astype(jnp.float32)

    tile = _choose_tile(rows)
    padded_rows = ((rows + tile - 1) // tile) * tile
    if padded_rows != rows:
        x = jnp.pad(x, ((0, padded_rows - rows), (0, 0)))

    itemsize = jnp.dtype(wslab.dtype).itemsize
    cost = pl.CostEstimate(
        flops=int(padded_rows * 2 * (T * E + 3 * E * E)),
        transcendentals=int(padded_rows * 10),
        bytes_accessed=int(padded_rows * (T + E) * 4
                           + (w1p.size + wslab.size) * itemsize + bias.size * 4),
    )

    out = pl.pallas_call(
        _make_kernel(group_slices),
        out_shape=jax.ShapeDtypeStruct((padded_rows, E), jnp.float32),
        grid=(padded_rows // tile,),
        in_specs=[
            pl.BlockSpec((tile, T), lambda i: (i, 0)),
            pl.BlockSpec(w1p.shape, lambda i: (0, 0)),
            pl.BlockSpec(wslab.shape, lambda i: (0, 0)),
            pl.BlockSpec(bias.shape, lambda i: (0, 0)),
        ],
        out_specs=pl.BlockSpec((tile, E), lambda i: (i, 0)),
        compiler_params=pltpu.CompilerParams(
            dimension_semantics=("parallel",),
            vmem_limit_bytes=32 * 1024 * 1024),
        cost_estimate=cost,
    )(x, w1p, wslab, bias)

    return out[:rows].reshape(B, N, E)


# ---------------- pure-JAX reference (unfolded, for correctness check) ----------------
def _ref_ln(h):
    mu = h.mean(-1, keepdims=True)
    var = ((h - mu) ** 2).mean(-1, keepdims=True)
    return (h - mu) / jnp.sqrt(var + LN_EPS)


def _ref_block(x, p):
    h = jnp.maximum(x @ p["w1"] + p["b1"], 0.0)
    h = _ref_ln(h) * p["g1"] + p["be1"]
    h = jnp.maximum(h @ p["w2"] + p["b2"], 0.0)
    return _ref_ln(h) * p["g2"] + p["be2"]


def ref_forward(trajs, params):
    pos_p, dim_p, ori_p, vel_p, fus_p = params
    pos = _ref_block(trajs[..., X:Z + 1], pos_p)
    dim = _ref_block(trajs[..., LENGTH:HEIGHT + 1], dim_p)
    ori = _ref_block(trajs[..., COS_YAW:SIN_YAW + 1], ori_p)
    vel = _ref_block(trajs[..., VX:VY + 1], vel_p)
    cat = jnp.concatenate([pos, dim, ori, vel], axis=-1)
    return _ref_block(cat, fus_p)


# ---------------- main ----------------
if __name__ == "__main__":
    # module config
    pos_embed_dim = dim_embed_dim = orientation_embed_dim = vel_embed_dim = 32
    embed_dim = pos_embed_dim + dim_embed_dim + orientation_embed_dim + vel_embed_dim  # 128

    B, N = 2, 100  # batch, num anchors/queries (rows=200 exercises padding + multi-step grid)

    key = jax.random.PRNGKey(0)
    k_in, k_pos, k_dim, k_ori, k_vel, k_fus = jax.random.split(key, 6)

    trajs = jax.random.normal(k_in, (B, N, END_OF_INDEX), jnp.float32)

    pos_p = make_embed_params(k_pos, 3, pos_embed_dim)
    dim_p = make_embed_params(k_dim, 3, dim_embed_dim)
    ori_p = make_embed_params(k_ori, 2, orientation_embed_dim)
    vel_p = make_embed_params(k_vel, 2, vel_embed_dim)
    fus_p = make_embed_params(k_fus, embed_dim, embed_dim)

    # weight_dtype=jnp.bfloat16 is available for v6e/v7x deployments; f32 here for a
    # tight numerical comparison with the unfolded reference.
    packed = pack_params(pos_p, dim_p, ori_p, vel_p, fus_p, weight_dtype=jnp.float32)

    out = anchor_encoder_forward(trajs, packed)
    out = jax.block_until_ready(out)

    ref = ref_forward(trajs, (pos_p, dim_p, ori_p, vel_p, fus_p))
    assert out.shape == (B, N, embed_dim)
    assert jnp.allclose(out, ref, atol=1e-4, rtol=1e-4), \
        float(jnp.max(jnp.abs(out - ref)))

    print("KERNEL_OK")
</pallas_src>

<mosaic_0001>
module attributes {stable_mosaic.version = 11 : i64} {
  func.func @kernel(%arg0: i32, %arg1: memref<64x10xf32, #tpu.memory_space<vmem>>, %arg2: memref<10x128xf32, #tpu.memory_space<vmem>>, %arg3: memref<384x128xf32, #tpu.memory_space<vmem>>, %arg4: memref<8x128xf32, #tpu.memory_space<vmem>>, %arg5: memref<64x128xf32, #tpu.memory_space<vmem>>) attributes {dimension_semantics = [#tpu.dimension_semantics<parallel>], iteration_bounds = array<i64: 4>, scalar_prefetch = 0 : i64, scratch_operands = 0 : i64, tpu.core_type = #tpu.core_type<tc>, window_params = [{transform_indices = @transform_0, window_bounds = array<i64: 64, 10>}, {pipeline_mode = #tpu.pipeline_mode<synchronous>, transform_indices = @transform_1, window_bounds = array<i64: 10, 128>}, {pipeline_mode = #tpu.pipeline_mode<synchronous>, transform_indices = @transform_2, window_bounds = array<i64: 384, 128>}, {pipeline_mode = #tpu.pipeline_mode<synchronous>, transform_indices = @transform_3, window_bounds = array<i64: 8, 128>}, {transform_indices = @transform_4, window_bounds = array<i64: 64, 128>}]} {
    %c0 = arith.constant 0 : index
    %c0_0 = arith.constant 0 : index
    %0 = vector.load %arg4[%c0, %c0_0] : memref<8x128xf32, #tpu.memory_space<vmem>>, vector<8x128xf32>
    %1 = vector.extract_strided_slice %0 {offsets = [0, 0], sizes = [1, 128], strides = [1, 1]} : vector<8x128xf32> to vector<1x128xf32>
    %2 = vector.extract_strided_slice %0 {offsets = [1, 0], sizes = [1, 128], strides = [1, 1]} : vector<8x128xf32> to vector<1x128xf32>
    %3 = vector.extract_strided_slice %0 {offsets = [2, 0], sizes = [1, 128], strides = [1, 1]} : vector<8x128xf32> to vector<1x128xf32>
    %4 = vector.extract_strided_slice %0 {offsets = [3, 0], sizes = [1, 128], strides = [1, 1]} : vector<8x128xf32> to vector<1x128xf32>
    %5 = vector.extract_strided_slice %0 {offsets = [4, 0], sizes = [1, 128], strides = [1, 1]} : vector<8x128xf32> to vector<1x128xf32>
    %6 = vector.extract_strided_slice %0 {offsets = [5, 0], sizes = [1, 128], strides = [1, 1]} : vector<8x128xf32> to vector<1x128xf32>
    %7 = tpu.iota {dimensions = array<i32: 1>} : vector<1x128xi32>
    %c0_i32 = arith.constant 0 : i32
    %8 = vector.broadcast %c0_i32 : i32 to vector<1x128xi32>
    %9 = arith.cmpi sge, %7, %8 : vector<1x128xi32>
    %c32_i32 = arith.constant 32 : i32
    %10 = vector.broadcast %c32_i32 : i32 to vector<1x128xi32>
    %11 = arith.cmpi slt, %7, %10 : vector<1x128xi32>
    %12 = arith.andi %9, %11 : vector<1x128xi1>
    %13 = arith.extui %12 : vector<1x128xi1> to vector<1x128xi32>
    %14 = arith.sitofp %13 : vector<1x128xi32> to vector<1x128xf32>
    %c32_i32_1 = arith.constant 32 : i32
    %15 = vector.broadcast %c32_i32_1 : i32 to vector<1x128xi32>
    %16 = arith.cmpi sge, %7, %15 : vector<1x128xi32>
    %c64_i32 = arith.constant 64 : i32
    %17 = vector.broadcast %c64_i32 : i32 to vector<1x128xi32>
    %18 = arith.cmpi slt, %7, %17 : vector<1x128xi32>
    %19 = arith.andi %16, %18 : vector<1x128xi1>
    %20 = arith.extui %19 : vector<1x128xi1> to vector<1x128xi32>
    %21 = arith.sitofp %20 : vector<1x128xi32> to vector<1x128xf32>
    %c64_i32_2 = arith.constant 64 : i32
    %22 = vector.broadcast %c64_i32_2 : i32 to vector<1x128xi32>
    %23 = arith.cmpi sge, %7, %22 : vector<1x128xi32>
    %c96_i32 = arith.constant 96 : i32
    %24 = vector.broadcast %c96_i32 : i32 to vector<1x128xi32>
    %25 = arith.cmpi slt, %7, %24 : vector<1x128xi32>
    %26 = arith.andi %23, %25 : vector<1x128xi1>
    %27 = arith.extui %26 : vector<1x128xi1> to vector<1x128xi32>
    %28 = arith.sitofp %27 : vector<1x128xi32> to vector<1x128xf32>
    %c96_i32_3 = arith.constant 96 : i32
    %29 = vector.broadcast %c96_i32_3 : i32 to vector<1x128xi32>
    %30 = arith.cmpi sge, %7, %29 : vector<1x128xi32>
    %c128_i32 = arith.constant 128 : i32
    %31 = vector.broadcast %c128_i32 : i32 to vector<1x128xi32>
    %32 = arith.cmpi slt, %7, %31 : vector<1x128xi32>
    %33 = arith.andi %30, %32 : vector<1x128xi1>
    %34 = arith.extui %33 : vector<1x128xi1> to vector<1x128xi32>
    %35 = arith.sitofp %34 : vector<1x128xi32> to vector<1x128xf32>
    %c0_4 = arith.constant 0 : index
    %c0_5 = arith.constant 0 : index
    %36 = vector.load %arg1[%c0_4, %c0_5] : memref<64x10xf32, #tpu.memory_space<vmem>>, vector<64x10xf32>
    %c0_6 = arith.constant 0 : index
    %c0_7 = arith.constant 0 : index
    %37 = vector.load %arg2[%c0_6, %c0_7] : memref<10x128xf32, #tpu.memory_space<vmem>>, vector<10x128xf32>
    %cst = arith.constant dense<0.000000e+00> : vector<64x128xf32>
    %38 = tpu.matmul %36, %37, %cst {dimension_numbers = #tpu.dot_dimension_numbers<[1], [0], [0], [1], [0, 0, 1, 1], [], []>} : vector<64x10xf32>, vector<10x128xf32>, vector<64x128xf32> -> vector<64x128xf32>
    %39 = vector.broadcast %1 : vector<1x128xf32> to vector<64x128xf32>
    %40 = arith.addf %38, %39 : vector<64x128xf32>
    %cst_8 = arith.constant 0.000000e+00 : f32
    %41 = vector.broadcast %cst_8 : f32 to vector<64x128xf32>
    %42 = arith.maximumf %40, %41 : vector<64x128xf32>
    %cst_9 = arith.constant 0.000000e+00 : f32
    %43 = vector.broadcast %cst_9 : f32 to vector<64x128xf32>
    %44 = vector.broadcast %14 : vector<1x128xf32> to vector<64x128xf32>
    %45 = arith.mulf %42, %44 : vector<64x128xf32>
    %cst_10 = arith.constant dense<0.000000e+00> : vector<64xf32>
    %46 = vector.multi_reduction <add>, %45, %cst_10 [1] : vector<64x128xf32> to vector<64xf32>
    %47 = vector.shape_cast %46 : vector<64xf32> to vector<64x1xf32>
    %cst_11 = arith.constant 3.125000e-02 : f32
    %48 = vector.broadcast %cst_11 : f32 to vector<64x1xf32>
    %49 = arith.mulf %47, %48 : vector<64x1xf32>
    %50 = vector.broadcast %49 : vector<64x1xf32> to vector<64x128xf32>
    %51 = vector.broadcast %14 : vector<1x128xf32> to vector<64x128xf32>
    %52 = arith.mulf %50, %51 : vector<64x128xf32>
    %53 = arith.addf %43, %52 : vector<64x128xf32>
    %54 = vector.broadcast %21 : vector<1x128xf32> to vector<64x128xf32>
    %55 = arith.mulf %42, %54 : vector<64x128xf32>
    %cst_12 = arith.constant dense<0.000000e+00> : vector<64xf32>
    %56 = vector.multi_reduction <add>, %55, %cst_12 [1] : vector<64x128xf32> to vector<64xf32>
    %57 = vector.shape_cast %56 : vector<64xf32> to vector<64x1xf32>
    %cst_13 = arith.constant 3.125000e-02 : f32
    %58 = vector.broadcast %cst_13 : f32 to vector<64x1xf32>
    %59 = arith.mulf %57, %58 : vector<64x1xf32>
    %60 = vector.broadcast %59 : vector<64x1xf32> to vector<64x128xf32>
    %61 = vector.broadcast %21 : vector<1x128xf32> to vector<64x128xf32>
    %62 = arith.mulf %60, %61 : vector<64x128xf32>
    %63 = arith.addf %53, %62 : vector<64x128xf32>
    %64 = vector.broadcast %28 : vector<1x128xf32> to vector<64x128xf32>
    %65 = arith.mulf %42, %64 : vector<64x128xf32>
    %cst_14 = arith.constant dense<0.000000e+00> : vector<64xf32>
    %66 = vector.multi_reduction <add>, %65, %cst_14 [1] : vector<64x128xf32> to vector<64xf32>
    %67 = vector.shape_cast %66 : vector<64xf32> to vector<64x1xf32>
    %cst_15 = arith.constant 3.125000e-02 : f32
    %68 = vector.broadcast %cst_15 : f32 to vector<64x1xf32>
    %69 = arith.mulf %67, %68 : vector<64x1xf32>
    %70 = vector.broadcast %69 : vector<64x1xf32> to vector<64x128xf32>
    %71 = vector.broadcast %28 : vector<1x128xf32> to vector<64x128xf32>
    %72 = arith.mulf %70, %71 : vector<64x128xf32>
    %73 = arith.addf %63, %72 : vector<64x128xf32>
    %74 = vector.broadcast %35 : vector<1x128xf32> to vector<64x128xf32>
    %75 = arith.mulf %42, %74 : vector<64x128xf32>
    %cst_16 = arith.constant dense<0.000000e+00> : vector<64xf32>
    %76 = vector.multi_reduction <add>, %75, %cst_16 [1] : vector<64x128xf32> to vector<64xf32>
    %77 = vector.shape_cast %76 : vector<64xf32> to vector<64x1xf32>
    %cst_17 = arith.constant 3.125000e-02 : f32
    %78 = vector.broadcast %cst_17 : f32 to vector<64x1xf32>
    %79 = arith.mulf %77, %78 : vector<64x1xf32>
    %80 = vector.broadcast %79 : vector<64x1xf32> to vector<64x128xf32>
    %81 = vector.broadcast %35 : vector<1x128xf32> to vector<64x128xf32>
    %82 = arith.mulf %80, %81 : vector<64x128xf32>
    %83 = arith.addf %73, %82 : vector<64x128xf32>
    %84 = arith.subf %42, %83 : vector<64x128xf32>
    %85 = arith.mulf %84, %84 : vector<64x128xf32>
    %cst_18 = arith.constant 0.000000e+00 : f32
    %86 = vector.broadcast %cst_18 : f32 to vector<64x128xf32>
    %87 = vector.broadcast %14 : vector<1x128xf32> to vector<64x128xf32>
    %88 = arith.mulf %85, %87 : vector<64x128xf32>
    %cst_19 = arith.constant dense<0.000000e+00> : vector<64xf32>
    %89 = vector.multi_reduction <add>, %88, %cst_19 [1] : vector<64x128xf32> to vector<64xf32>
    %90 = vector.shape_cast %89 : vector<64xf32> to vector<64x1xf32>
    %cst_20 = arith.constant 3.125000e-02 : f32
    %91 = vector.broadcast %cst_20 : f32 to vector<64x1xf32>
    %92 = arith.mulf %90, %91 : vector<64x1xf32>
    %cst_21 = arith.constant 9.99999974E-6 : f32
    %93 = vector.broadcast %cst_21 : f32 to vector<64x1xf32>
    %94 = arith.addf %92, %93 : vector<64x1xf32>
    %95 = math.rsqrt %94 : vector<64x1xf32>
    %96 = vector.broadcast %95 : vector<64x1xf32> to vector<64x128xf32>
    %97 = vector.broadcast %14 : vector<1x128xf32> to vector<64x128xf32>
    %98 = arith.mulf %96, %97 : vector<64x128xf32>
    %99 = arith.addf %86, %98 : vector<64x128xf32>
    %100 = vector.broadcast %21 : vector<1x128xf32> to vector<64x128xf32>
    %101 = arith.mulf %85, %100 : vector<64x128xf32>
    %cst_22 = arith.constant dense<0.000000e+00> : vector<64xf32>
    %102 = vector.multi_reduction <add>, %101, %cst_22 [1] : vector<64x128xf32> to vector<64xf32>
    %103 = vector.shape_cast %102 : vector<64xf32> to vector<64x1xf32>
    %cst_23 = arith.constant 3.125000e-02 : f32
    %104 = vector.broadcast %cst_23 : f32 to vector<64x1xf32>
    %105 = arith.mulf %103, %104 : vector<64x1xf32>
    %cst_24 = arith.constant 9.99999974E-6 : f32
    %106 = vector.broadcast %cst_24 : f32 to vector<64x1xf32>
    %107 = arith.addf %105, %106 : vector<64x1xf32>
    %108 = math.rsqrt %107 : vector<64x1xf32>
    %109 = vector.broadcast %108 : vector<64x1xf32> to vector<64x128xf32>
    %110 = vector.broadcast %21 : vector<1x128xf32> to vector<64x128xf32>
    %111 = arith.mulf %109, %110 : vector<64x128xf32>
    %112 = arith.addf %99, %111 : vector<64x128xf32>
    %113 = vector.broadcast %28 : vector<1x128xf32> to vector<64x128xf32>
    %114 = arith.mulf %85, %113 : vector<64x128xf32>
    %cst_25 = arith.constant dense<0.000000e+00> : vector<64xf32>
    %115 = vector.multi_reduction <add>, %114, %cst_25 [1] : vector<64x128xf32> to vector<64xf32>
    %116 = vector.shape_cast %115 : vector<64xf32> to vector<64x1xf32>
    %cst_26 = arith.constant 3.125000e-02 : f32
    %117 = vector.broadcast %cst_26 : f32 to vector<64x1xf32>
    %118 = arith.mulf %116, %117 : vector<64x1xf32>
    %cst_27 = arith.constant 9.99999974E-6 : f32
    %119 = vector.broadcast %cst_27 : f32 to vector<64x1xf32>
    %120 = arith.addf %118, %119 : vector<64x1xf32>
    %121 = math.rsqrt %120 : vector<64x1xf32>
    %122 = vector.broadcast %121 : vector<64x1xf32> to vector<64x128xf32>
    %123 = vector.broadcast %28 : vector<1x128xf32> to vector<64x128xf32>
    %124 = arith.mulf %122, %123 : vector<64x128xf32>
    %125 = arith.addf %112, %124 : vector<64x128xf32>
    %126 = vector.broadcast %35 : vector<1x128xf32> to vector<64x128xf32>
    %127 = arith.mulf %85, %126 : vector<64x128xf32>
    %cst_28 = arith.constant dense<0.000000e+00> : vector<64xf32>
    %128 = vector.multi_reduction <add>, %127, %cst_28 [1] : vector<64x128xf32> to vector<64xf32>
    %129 = vector.shape_cast %128 : vector<64xf32> to vector<64x1xf32>
    %cst_29 = arith.constant 3.125000e-02 : f32
    %130 = vector.broadcast %cst_29 : f32 to vector<64x1xf32>
    %131 = arith.mulf %129, %130 : vector<64x1xf32>
    %cst_30 = arith.constant 9.99999974E-6 : f32
    %132 = vector.broadcast %cst_30 : f32 to vector<64x1xf32>
    %133 = arith.addf %131, %132 : vector<64x1xf32>
    %134 = math.rsqrt %133 : vector<64x1xf32>
    %135 = vector.broadcast %134 : vector<64x1xf32> to vector<64x128xf32>
    %136 = vector.broadcast %35 : vector<1x128xf32> to vector<64x128xf32>
    %137 = arith.mulf %135, %136 : vector<64x128xf32>
    %138 = arith.addf %125, %137 : vector<64x128xf32>
    %139 = arith.mulf %84, %138 : vector<64x128xf32>
    %c0_31 = arith.constant 0 : index
    %c0_32 = arith.constant 0 : index
    %140 = vector.load %arg3[%c0_31, %c0_32] : memref<384x128xf32, #tpu.memory_space<vmem>>, vector<128x128xf32>
    %cst_33 = arith.constant dense<0.000000e+00> : vector<64x128xf32>
    %141 = tpu.matmul %139, %140, %cst_33 {dimension_numbers = #tpu.dot_dimension_numbers<[1], [0], [0], [1], [0, 0, 1, 1], [], []>} : vector<64x128xf32>, vector<128x128xf32>, vector<64x128xf32> -> vector<64x128xf32>
    %142 = vector.broadcast %2 : vector<1x128xf32> to vector<64x128xf32>
    %143 = arith.addf %141, %142 : vector<64x128xf32>
    %cst_34 = arith.constant 0.000000e+00 : f32
    %144 = vector.broadcast %cst_34 : f32 to vector<64x128xf32>
    %145 = arith.maximumf %143, %144 : vector<64x128xf32>
    %cst_35 = arith.constant 0.000000e+00 : f32
    %146 = vector.broadcast %cst_35 : f32 to vector<64x128xf32>
    %147 = vector.broadcast %14 : vector<1x128xf32> to vector<64x128xf32>
    %148 = arith.mulf %145, %147 : vector<64x128xf32>
    %cst_36 = arith.constant dense<0.000000e+00> : vector<64xf32>
    %149 = vector.multi_reduction <add>, %148, %cst_36 [1] : vector<64x128xf32> to vector<64xf32>
    %150 = vector.shape_cast %149 : vector<64xf32> to vector<64x1xf32>
    %cst_37 = arith.constant 3.125000e-02 : f32
    %151 = vector.broadcast %cst_37 : f32 to vector<64x1xf32>
    %152 = arith.mulf %150, %151 : vector<64x1xf32>
    %153 = vector.broadcast %152 : vector<64x1xf32> to vector<64x128xf32>
    %154 = vector.broadcast %14 : vector<1x128xf32> to vector<64x128xf32>
    %155 = arith.mulf %153, %154 : vector<64x128xf32>
    %156 = arith.addf %146, %155 : vector<64x128xf32>
    %157 = vector.broadcast %21 : vector<1x128xf32> to vector<64x128xf32>
    %158 = arith.mulf %145, %157 : vector<64x128xf32>
    %cst_38 = arith.constant dense<0.000000e+00> : vector<64xf32>
    %159 = vector.multi_reduction <add>, %158, %cst_38 [1] : vector<64x128xf32> to vector<64xf32>
    %160 = vector.shape_cast %159 : vector<64xf32> to vector<64x1xf32>
    %cst_39 = arith.constant 3.125000e-02 : f32
    %161 = vector.broadcast %cst_39 : f32 to vector<64x1xf32>
    %162 = arith.mulf %160, %161 : vector<64x1xf32>
    %163 = vector.broadcast %162 : vector<64x1xf32> to vector<64x128xf32>
    %164 = vector.broadcast %21 : vector<1x128xf32> to vector<64x128xf32>
    %165 = arith.mulf %163, %164 : vector<64x128xf32>
    %166 = arith.addf %156, %165 : vector<64x128xf32>
    %167 = vector.broadcast %28 : vector<1x128xf32> to vector<64x128xf32>
    %168 = arith.mulf %145, %167 : vector<64x128xf32>
    %cst_40 = arith.constant dense<0.000000e+00> : vector<64xf32>
    %169 = vector.multi_reduction <add>, %168, %cst_40 [1] : vector<64x128xf32> to vector<64xf32>
    %170 = vector.shape_cast %169 : vector<64xf32> to vector<64x1xf32>
    %cst_41 = arith.constant 3.125000e-02 : f32
    %171 = vector.broadcast %cst_41 : f32 to vector<64x1xf32>
    %172 = arith.mulf %170, %171 : vector<64x1xf32>
    %173 = vector.broadcast %172 : vector<64x1xf32> to vector<64x128xf32>
    %174 = vector.broadcast %28 : vector<1x128xf32> to vector<64x128xf32>
    %175 = arith.mulf %173, %174 : vector<64x128xf32>
    %176 = arith.addf %166, %175 : vector<64x128xf32>
    %177 = vector.broadcast %35 : vector<1x128xf32> to vector<64x128xf32>
    %178 = arith.mulf %145, %177 : vector<64x128xf32>
    %cst_42 = arith.constant dense<0.000000e+00> : vector<64xf32>
    %179 = vector.multi_reduction <add>, %178, %cst_42 [1] : vector<64x128xf32> to vector<64xf32>
    %180 = vector.shape_cast %179 : vector<64xf32> to vector<64x1xf32>
    %cst_43 = arith.constant 3.125000e-02 : f32
    %181 = vector.broadcast %cst_43 : f32 to vector<64x1xf32>
    %182 = arith.mulf %180, %181 : vector<64x1xf32>
    %183 = vector.broadcast %182 : vector<64x1xf32> to vector<64x128xf32>
    %184 = vector.broadcast %35 : vector<1x128xf32> to vector<64x128xf32>
    %185 = arith.mulf %183, %184 : vector<64x128xf32>
    %186 = arith.addf %176, %185 : vector<64x128xf32>
    %187 = arith.subf %145, %186 : vector<64x128xf32>
    %188 = arith.mulf %187, %187 : vector<64x128xf32>
    %cst_44 = arith.constant 0.000000e+00 : f32
    %189 = vector.broadcast %cst_44 : f32 to vector<64x128xf32>
    %190 = vector.broadcast %14 : vector<1x128xf32> to vector<64x128xf32>
    %191 = arith.mulf %188, %190 : vector<64x128xf32>
    %cst_45 = arith.constant dense<0.000000e+00> : vector<64xf32>
    %192 = vector.multi_reduction <add>, %191, %cst_45 [1] : vector<64x128xf32> to vector<64xf32>
    %193 = vector.shape_cast %192 : vector<64xf32> to vector<64x1xf32>
    %cst_46 = arith.constant 3.125000e-02 : f32
    %194 = vector.broadcast %cst_46 : f32 to vector<64x1xf32>
    %195 = arith.mulf %193, %194 : vector<64x1xf32>
    %cst_47 = arith.constant 9.99999974E-6 : f32
    %196 = vector.broadcast %cst_47 : f32 to vector<64x1xf32>
    %197 = arith.addf %195, %196 : vector<64x1xf32>
    %198 = math.rsqrt %197 : vector<64x1xf32>
    %199 = vector.broadcast %198 : vector<64x1xf32> to vector<64x128xf32>
    %200 = vector.broadcast %14 : vector<1x128xf32> to vector<64x128xf32>
    %201 = arith.mulf %199, %200 : vector<64x128xf32>
    %202 = arith.addf %189, %201 : vector<64x128xf32>
    %203 = vector.broadcast %21 : vector<1x128xf32> to vector<64x128xf32>
    %204 = arith.mulf %188, %203 : vector<64x128xf32>
    %cst_48 = arith.constant dense<0.000000e+00> : vector<64xf32>
    %205 = vector.multi_reduction <add>, %204, %cst_48 [1] : vector<64x128xf32> to vector<64xf32>
    %206 = vector.shape_cast %205 : vector<64xf32> to vector<64x1xf32>
    %cst_49 = arith.constant 3.125000e-02 : f32
    %207 = vector.broadcast %cst_49 : f32 to vector<64x1xf32>
    %208 = arith.mulf %206, %207 : vector<64x1xf32>
    %cst_50 = arith.constant 9.99999974E-6 : f32
    %209 = vector.broadcast %cst_50 : f32 to vector<64x1xf32>
    %210 = arith.addf %208, %209 : vector<64x1xf32>
    %211 = math.rsqrt %210 : vector<64x1xf32>
    %212 = vector.broadcast %211 : vector<64x1xf32> to vector<64x128xf32>
    %213 = vector.broadcast %21 : vector<1x128xf32> to vector<64x128xf32>
    %214 = arith.mulf %212, %213 : vector<64x128xf32>
    %215 = arith.addf %202, %214 : vector<64x128xf32>
    %216 = vector.broadcast %28 : vector<1x128xf32> to vector<64x128xf32>
    %217 = arith.mulf %188, %216 : vector<64x128xf32>
    %cst_51 = arith.constant dense<0.000000e+00> : vector<64xf32>
    %218 = vector.multi_reduction <add>, %217, %cst_51 [1] : vector<64x128xf32> to vector<64xf32>
    %219 = vector.shape_cast %218 : vector<64xf32> to vector<64x1xf32>
    %cst_52 = arith.constant 3.125000e-02 : f32
    %220 = vector.broadcast %cst_52 : f32 to vector<64x1xf32>
    %221 = arith.mulf %219, %220 : vector<64x1xf32>
    %cst_53 = arith.constant 9.99999974E-6 : f32
    %222 = vector.broadcast %cst_53 : f32 to vector<64x1xf32>
    %223 = arith.addf %221, %222 : vector<64x1xf32>
    %224 = math.rsqrt %223 : vector<64x1xf32>
    %225 = vector.broadcast %224 : vector<64x1xf32> to vector<64x128xf32>
    %226 = vector.broadcast %28 : vector<1x128xf32> to vector<64x128xf32>
    %227 = arith.mulf %225, %226 : vector<64x128xf32>
    %228 = arith.addf %215, %227 : vector<64x128xf32>
    %229 = vector.broadcast %35 : vector<1x128xf32> to vector<64x128xf32>
    %230 = arith.mulf %188, %229 : vector<64x128xf32>
    %cst_54 = arith.constant dense<0.000000e+00> : vector<64xf32>
    %231 = vector.multi_reduction <add>, %230, %cst_54 [1] : vector<64x128xf32> to vector<64xf32>
    %232 = vector.shape_cast %231 : vector<64xf32> to vector<64x1xf32>
    %cst_55 = arith.constant 3.125000e-02 : f32
    %233 = vector.broadcast %cst_55 : f32 to vector<64x1xf32>
    %234 = arith.mulf %232, %233 : vector<64x1xf32>
    %cst_56 = arith.constant 9.99999974E-6 : f32
    %235 = vector.broadcast %cst_56 : f32 to vector<64x1xf32>
    %236 = arith.addf %234, %235 : vector<64x1xf32>
    %237 = math.rsqrt %236 : vector<64x1xf32>
    %238 = vector.broadcast %237 : vector<64x1xf32> to vector<64x128xf32>
    %239 = vector.broadcast %35 : vector<1x128xf32> to vector<64x128xf32>
    %240 = arith.mulf %238, %239 : vector<64x128xf32>
    %241 = arith.addf %228, %240 : vector<64x128xf32>
    %242 = arith.mulf %187, %241 : vector<64x128xf32>
    %c128 = arith.constant 128 : index
    %c0_57 = arith.constant 0 : index
    %243 = vector.load %arg3[%c128, %c0_57] : memref<384x128xf32, #tpu.memory_space<vmem>>, vector<128x128xf32>
    %cst_58 = arith.constant dense<0.000000e+00> : vector<64x128xf32>
    %244 = tpu.matmul %242, %243, %cst_58 {dimension_numbers = #tpu.dot_dimension_numbers<[1], [0], [0], [1], [0, 0, 1, 1], [], []>} : vector<64x128xf32>, vector<128x128xf32>, vector<64x128xf32> -> vector<64x128xf32>
    %245 = vector.broadcast %3 : vector<1x128xf32> to vector<64x128xf32>
    %246 = arith.addf %244, %245 : vector<64x128xf32>
    %cst_59 = arith.constant 0.000000e+00 : f32
    %247 = vector.broadcast %cst_59 : f32 to vector<64x128xf32>
    %248 = arith.maximumf %246, %247 : vector<64x128xf32>
    %cst_60 = arith.constant dense<0.000000e+00> : vector<64xf32>
    %249 = vector.multi_reduction <add>, %248, %cst_60 [1] : vector<64x128xf32> to vector<64xf32>
    %250 = vector.shape_cast %249 : vector<64xf32> to vector<64x1xf32>
    %cst_61 = arith.constant 1.280000e+02 : f32
    %251 = vector.broadcast %cst_61 : f32 to vector<64x1xf32>
    %252 = arith.divf %250, %251 : vector<64x1xf32>
    %253 = vector.broadcast %252 : vector<64x1xf32> to vector<64x128xf32>
    %254 = arith.subf %248, %253 : vector<64x128xf32>
    %255 = arith.mulf %254, %254 : vector<64x128xf32>
    %cst_62 = arith.constant dense<0.000000e+00> : vector<64xf32>
    %256 = vector.multi_reduction <add>, %255, %cst_62 [1] : vector<64x128xf32> to vector<64xf32>
    %257 = vector.shape_cast %256 : vector<64xf32> to vector<64x1xf32>
    %cst_63 = arith.constant 1.280000e+02 : f32
    %258 = vector.broadcast %cst_63 : f32 to vector<64x1xf32>
    %259 = arith.divf %257, %258 : vector<64x1xf32>
    %cst_64 = arith.constant 9.99999974E-6 : f32
    %260 = vector.broadcast %cst_64 : f32 to vector<64x1xf32>
    %261 = arith.addf %259, %260 : vector<64x1xf32>
    %262 = math.rsqrt %261 : vector<64x1xf32>
    %263 = vector.broadcast %262 : vector<64x1xf32> to vector<64x128xf32>
    %264 = arith.mulf %254, %263 : vector<64x128xf32>
    %c256 = arith.constant 256 : index
    %c0_65 = arith.constant 0 : index
    %265 = vector.load %arg3[%c256, %c0_65] : memref<384x128xf32, #tpu.memory_space<vmem>>, vector<128x128xf32>
    %cst_66 = arith.constant dense<0.000000e+00> : vector<64x128xf32>
    %266 = tpu.matmul %264, %265, %cst_66 {dimension_numbers = #tpu.dot_dimension_numbers<[1], [0], [0], [1], [0, 0, 1, 1], [], []>} : vector<64x128xf32>, vector<128x128xf32>, vector<64x128xf32> -> vector<64x128xf32>
    %267 = vector.broadcast %4 : vector<1x128xf32> to vector<64x128xf32>
    %268 = arith.addf %266, %267 : vector<64x128xf32>
    %cst_67 = arith.constant 0.000000e+00 : f32
    %269 = vector.broadcast %cst_67 : f32 to vector<64x128xf32>
    %270 = arith.maximumf %268, %269 : vector<64x128xf32>
    %cst_68 = arith.constant dense<0.000000e+00> : vector<64xf32>
    %271 = vector.multi_reduction <add>, %270, %cst_68 [1] : vector<64x128xf32> to vector<64xf32>
    %272 = vector.shape_cast %271 : vector<64xf32> to vector<64x1xf32>
    %cst_69 = arith.constant 1.280000e+02 : f32
    %273 = vector.broadcast %cst_69 : f32 to vector<64x1xf32>
    %274 = arith.divf %272, %273 : vector<64x1xf32>
    %275 = vector.broadcast %274 : vector<64x1xf32> to vector<64x128xf32>
    %276 = arith.subf %270, %275 : vector<64x128xf32>
    %277 = arith.mulf %276, %276 : vector<64x128xf32>
    %cst_70 = arith.constant dense<0.000000e+00> : vector<64xf32>
    %278 = vector.multi_reduction <add>, %277, %cst_70 [1] : vector<64x128xf32> to vector<64xf32>
    %279 = vector.shape_cast %278 : vector<64xf32> to vector<64x1xf32>
    %cst_71 = arith.constant 1.280000e+02 : f32
    %280 = vector.broadcast %cst_71 : f32 to vector<64x1xf32>
    %281 = arith.divf %279, %280 : vector<64x1xf32>
    %cst_72 = arith.constant 9.99999974E-6 : f32
    %282 = vector.broadcast %cst_72 : f32 to vector<64x1xf32>
    %283 = arith.addf %281, %282 : vector<64x1xf32>
    %284 = math.rsqrt %283 : vector<64x1xf32>
    %285 = vector.broadcast %284 : vector<64x1xf32> to vector<64x128xf32>
    %286 = arith.mulf %276, %285 : vector<64x128xf32>
    %287 = vector.broadcast %5 : vector<1x128xf32> to vector<64x128xf32>
    %288 = arith.mulf %286, %287 : vector<64x128xf32>
    %289 = vector.broadcast %6 : vector<1x128xf32> to vector<64x128xf32>
    %290 = arith.addf %288, %289 : vector<64x128xf32>
    %c0_73 = arith.constant 0 : index
    %c0_74 = arith.constant 0 : index
    %291 = vector.load %arg5[%c0_73, %c0_74] : memref<64x128xf32, #tpu.memory_space<vmem>>, vector<64x128xf32>
    tpu.vector_store %arg5[%c0_73, %c0_74], %290 {strides = array<i32>} : memref<64x128xf32, #tpu.memory_space<vmem>>, vector<64x128xf32>,
    return
  }
  func.func @transform_0(%arg0: i32) -> (i32, i32) {
    %c0_i32 = arith.constant 0 : i32
    %c0_i32_0 = arith.constant 0 : i32
    return %arg0, %c0_i32 : i32, i32
  }
  func.func @transform_1(%arg0: i32) -> (i32, i32) {
    %c0_i32 = arith.constant 0 : i32
    %c0_i32_0 = arith.constant 0 : i32
    %c0_i32_1 = arith.constant 0 : i32
    return %c0_i32, %c0_i32_0 : i32, i32
  }
  func.func @transform_2(%arg0: i32) -> (i32, i32) {
    %c0_i32 = arith.constant 0 : i32
    %c0_i32_0 = arith.constant 0 : i32
    %c0_i32_1 = arith.constant 0 : i32
    return %c0_i32, %c0_i32_0 : i32, i32
  }
  func.func @transform_3(%arg0: i32) -> (i32, i32) {
    %c0_i32 = arith.constant 0 : i32
    %c0_i32_0 = arith.constant 0 : i32
    %c0_i32_1 = arith.constant 0 : i32
    return %c0_i32, %c0_i32_0 : i32, i32
  }
  func.func @transform_4(%arg0: i32) -> (i32, i32) {
    %c0_i32 = arith.constant 0 : i32
    %c0_i32_0 = arith.constant 0 : i32
    return %arg0, %c0_i32 : i32, i32
  }
}

</mosaic_0001>

<bundles_post_ra>
// kernel: tpu_custom_call.1
= control target key start
LH: loop header
LB: loop body
LE: loop exit
PB: predicated region body
PF: predicated region fallthrough
CT: control target
= control target key end

     0   :  { %9 = vsyncpa [#allocation3], 0  ;;  %s3525_s0 = inlined_call_operand.vmem [shape: f32[256,10], index: 0, kind: input, shape index: {}]   ;;  %s3526_s1 = inlined_call_operand.vmem [shape: f32[10,128], index: 1, kind: input, shape index: {}]   ;;  %s3527_s2 = inlined_call_operand.hbm [shape: f32[384,128], index: 2, kind: input, shape index: {}]   ;;  %s3528_s3 = inlined_call_operand.vmem [shape: f32[8,128], index: 3, kind: input, shape index: {}]   ;;  %s3529_s4 = inlined_call_operand.hbm [shape: f32[256,128], index: 4, kind: output, shape index: {}]  }
   0x1   :  { %10 = vsyncpa [#allocation4], 0 }
   0x2   :  { %12 = vsyncpa [#allocation4 + $0x1], 0  ;;  %s2756_s15 = smov 0   ;;  %s2758_s16 = smov 0  }
   0x3   :  { %s2760_s17 = smov 0   ;;  %s2762_s18 = smov 0  }
   0x4 LB: > { %s2777_s19 = sadd.s32 4294967295, %s2721_s18   ;;  %s2033_s20 = sadd.s32 4294967294, %s2721_s18   ;;  %s2721_s18 = sphi %s2762_s18, %s3545_s18   ;;  %s2717_s17 = sphi %s2760_s17, %s3544_s17   ;;  %s2713_s16 = sphi %s2758_s16, %s3543_s16   ;;  %s2709_s15 = sphi %s2756_s15, %s3542_s15  }
   0x5   : > { %s2781_s21 = sadd.s32 1, %s2721_s18   ;;  %s114_s22 = sadd.s32 1, %s2717_s17 }
   0x6   : > { %s111_s23 = ssub.s32 %s2721_s18, %s2781_s21  ;;  %p124_p0 = scmp.ne.s32.totalorder %s2717_s17, %s2713_s16 }
   0x7   : > { %p112_p1 = scmp.eq.s32.totalorder %s111_s23, 0  ;;  %p125_p2 = scmp.eq.s32.totalorder %s2777_s19, 3 }
   0x8   : > { %p130_p3 = scmp.ne.s32.totalorder %s2713_s16, %s2709_s15  ;;  %p131_p4 = scmp.eq.s32.totalorder %s2033_s20, 3 }
   0x9   : > { %s2792_s24 = scalar_select %p112_p1, %s2717_s17, %s114_s22  }
   0xa   : > { %p2794_p5 = por %p125_p2, %p124_p0  ;;  %p2798_p6 = por %p131_p4, %p130_p3 }
   0xb   : > { %p2034_p7 = scmp.ge.s32.totalorder %s2721_s18, 1  ;;  %p138_p8 = scmp.lt.s32.totalorder %s2721_s18, 5 }
   0xc   : > { %s3533_s25 = scalar_select %p2794_p5, 1, 0 }
   0xd   : > { %s3534_s26 = scalar_select %p2798_p6, 1, 0 }
   0xe   : > { %p3530_p9 = scmp.eq.s32.totalorder %s2777_s19, 0  ;;  %p2805_p10 = pnand %p2034_p7, %p138_p8 }
   0xf   : > { %s2723_s28 = smov [#allocation2]   ;;  %s2627_s7 = scalar_lea.hbm %s3527_s2, 6144 }
  0x10   : > { %s3535_s27 = scalar_select %p2805_p10, 1, 0 }
  0x11   : > { %s153_s29 = sshll.u32 %s2723_s28, 4  ;;  %p2415_p11 = pneg %p2805_p10  ;;  %s154_s29 = int_to_ptr.vmem [resolvable:$true] %s153_s29 }
  0x12   : > { %p2628_p13 = scmp.ne.s32.totalorder %s3527_s2, %s2627_s7  ;;  %p2634_p3 = scmp.lt.u32.totalorder %s2627_s7, %s3527_s2 }
  0x13   : > { %p2813_p12 = pnand %p3530_p9, %p2415_p11 }
  0x15   : > { %p2629_p0 = pneg %p2813_p12 }
  0x17   : > { %p2630_p1 = pnand %p2629_p0, %p2628_p13 }
  0x19   : > { %p2631_p2 = pneg %p2630_p1 }
  0x1b   : > { %p2636_p4 = pnand %p2634_p3, %p2631_p2 }
  0x1d   : > { %2639 = shalt.err (!%p2636_p4)
}
  0x1e   : > { %s2640_s12 = scalar_lea.vmem %s154_s29, 6144  ;;  %p2648_p9 = scmp.lt.s32.totalorder %s154_s29, %s154_s29 }
  0x1f   : > { %p2641_p7 = scmp.ne.s32.totalorder %s154_s29, %s2640_s12  ;;  %p2649_p6 = scmp.lt.s32.totalorder %s2640_s12, %s2640_s12 }
  0x21   : > { %p2643_p8 = pnand %p2641_p7, %p2629_p0  ;;  %p2650_p5 = por %p2649_p6, %p2648_p9 }
  0x23   : > { %p2644_p11 = pneg %p2643_p8 }
  0x25   : > { %p2651_p10 = pnand %p2650_p5, %p2644_p11 }
  0x27   : > { %2654 = shalt.err (!%p2651_p10)
}
  0x28   : > { %s2724_s13 = smov 128   ;;  %s2725_s14 = smov 8  }
  0x29   : > { %2418 = dma.hbm_to_vmem [thread:$0]  (!%p2813_p12), %s3527_s2, 6144, %s154_s29, [#allocation3], %s2724_s13, %s2724_s13, %s2725_s14  }
  0x2a   : > { %p3537_p13 = scmp.ne.s32.totalorder %s3535_s27, 0 }
  0x2b   : > { %p3538_p1 = scmp.eq.s32.totalorder (!%p3537_p13), %s2777_s19, 0 }
  0x2c   : > { %181 = sbr.rel (%p3537_p13) target bundleno = 2304 (0x900), region = 36 }
  0x33   : > { %2700 = dma.done.wait (%p3538_p1), [#allocation3], 6144   ;;  %p3539_p0 = pmov %p3538_p1 }
  0x34   : > { %s2040_s23 = sshll.u32 %s2777_s19, 3  ;;  %vm276_vm0 = vcmask 1041408   ;;  %vm251_vm1 = vcmask 80896   ;;  %vm2726_vm2 = vmmov 1   ;;  %v245_v0 = vld [vmem:[%s3526_s1] sm:$0xff]  ;;  %v215_v11 = vlaneseq  ;;  %s204_s20 = sand.u32 1, %s2713_s16  }
  0x35   : > { %2702 = vsyncadd (%p3539_p0), [#allocation3], 4294961152  ;;  %p208_p5 = scmp.lt.s32.totalorder %s2040_s23, 31  ;;  %v246_v1 = vld [vmem:[%s3526_s1 + $0x8] sm:$0x3]  ;;  %v214_v14 = vld [vmem:[%s3528_s3] sm:$0xff] }
  0x36   : > { %vm2292_vm3 = vmpackc.low %vm276_vm0, %vm2726_vm2  ;;  %v2291_v3 = vpack.c.bf16 %v246_v1, %v245_v0  ;;  %v2857_v12 = vshrl.u32 %v215_v11, 7  ;;  %v216_v15 = vand.u32 127, %v215_v11  ;;  %v2727_v20 = vmov 0.0   ;;  %s2039_s22 = sshll.u32 %s204_s20, 6  ;;  %p3540_p9 = scmp.ne.s32.totalorder %s3533_s25, 0 }
  0x37   : > { %s3547_s23 = smov (!%p208_p5, %s2040_s23), 31  ;;  %s2728_s7 = smov [#allocation5]  }
  0x38   : > { %s2041_s28 = sshll.u32 %s3547_s23, 3  ;;  %2293 = vmatprep.subr.msk.bf16.mxu0 %vm2292_vm3, %v2291_v3  ;;  %v249_v13 = vsub.s32 0, %v2857_v12  ;;  %vm218_vm4 = vcmp.lt.s32.totalorder %v216_v15, 32  ;;  %vm222_vm5 = vcmp.ge.s32.totalorder %v216_v15, 32  ;;  %vm223_vm6 = vcmp.lt.s32.totalorder %v216_v15, 64  ;;  %s3459_s23 = scalar_lea.vmem [#allocation5], %s2039_s22 }
  0x39   : > { %s211_s27 = scalar_lea.vmem %s3525_s0, %s2041_s28  ;;  %2296 = vmatpush3.bf16.msk.msra.mxu0 %vm2292_vm3, %v2291_v3  ;;  %v2866_v21 = vsel %vm218_vm4, 1.0, %v2727_v20  ;;  %vm224_vm7 = vmand %vm222_vm5, %vm223_vm6  ;;  %vm227_vm8 = vcmp.ge.s32.totalorder %v216_v15, 64  ;;  %vm228_vm9 = vcmp.lt.s32.totalorder %v216_v15, 96  ;;  %vm232_vm11 = vcmp.ge.s32.totalorder %v216_v15, 96  ;;  %s2060_s28 = sshll.u32 %s2777_s19, 10 }
  0x3a   : > { %v237_v2 = vld [vmem:[%s211_s27] sm:$0xff]  ;;  %v238_v4 = vld [vmem:[%s211_s27 + $0x8] sm:$0xff]  ;;  %v239_v5 = vld [vmem:[%s211_s27 + $0x10] sm:$0xff]  ;;  %v2863_v16 = vrot.slane %v214_v14, %v249_v13  ;;  %v2875_v28 = vsel %vm224_vm7, 1.0, %v2727_v20  ;;  %v2888_v39 = vsel %vm232_vm11, 1.0, %v2727_v20  ;;  %s1959_s30 = sshll.u32 %s3459_s23, 4  ;;  %s3476_s5 = scalar_lea.hbm %s3529_s4, %s2060_s28  ;;  %s3478_s30 = int_to_ptr.vmem [resolvable:$true] %s1959_s30 }
  0x3b   : > { %2147 = vmatprep.mubr.msk.f32.mxu0 %vm251_vm1, %v237_v2  ;;  %v240_v6 = vld [vmem:[%s211_s27 + $0x18] sm:$0xff]  ;;  %v241_v7 = vld [vmem:[%s211_s27 + $0x20] sm:$0xff]  ;;  %v242_v8 = vld [vmem:[%s211_s27 + $0x28] sm:$0xff]  ;;  %s3484_s19 = scalar_lea.sflag [#allocation4], %s204_s20  ;;  %s2655_s6 = scalar_lea.vmem %s3478_s30, 1024 }
  0x3c   : > { %2148 = vmatmul.mubr.msk.f32.vlgmr.msra.gmra.mrb[0].mxu0 %vm251_vm1, %v238_v4  ;;  %v243_v9 = vld [vmem:[%s211_s27 + $0x30] sm:$0xff]  ;;  %v244_v10 = vld [vmem:[%s211_s27 + $0x38] sm:$0xff]  ;;  %vm229_vm10 = vmand %vm227_vm8, %vm228_vm9  ;;  %p2656_p6 = scmp.ne.s32.totalorder %s3478_s30, %s2655_s6  ;;  %s2659_s8 = sshll.u32 %s2728_s7, 4  ;;  %s2660_s8 = int_to_ptr.vmem [resolvable:$false] %s2659_s8 }
  0x3d   : > { %2150 = vmatprep.mubr.msk.f32.mxu0 %vm251_vm1, %v239_v5  ;;  %v2881_v33 = vsel %vm229_vm10, 1.0, %v2727_v20  ;;  %s2661_s9 = scalar_lea.vmem %s2660_s8, 2048  ;;  %p2662_p2 = scmp.lt.s32.totalorder %s3478_s30, %s2660_s8 }
  0x3e   : > { %p2657_p10 = pnand %p2656_p6, %p3540_p9  ;;  %p2663_p3 = scmp.lt.s32.totalorder %s2661_s9, %s2655_s6 }
  0x40   : > { %2151 = vmatmul.mubr.msk.f32.gmra.mrb[2].mxu0 %vm251_vm1, %v240_v6  ;;  %p2658_p12 = pneg %p2657_p10  ;;  %p2664_p4 = por %p2663_p3, %p2662_p2 }
  0x41   : > { %2153 = vmatprep.mubr.msk.f32.mxu0 %vm251_vm1, %v241_v7 }
  0x42   : > { %p2665_p7 = pnand %p2664_p4, %p2658_p12 }
  0x44   : > { %2154 = vmatmul.mubr.msk.f32.gmra.mrb[4].mxu0 %vm251_vm1, %v242_v8 }
  0x45   : > { %2156 = vmatprep.mubr.msk.f32.mxu0 %vm251_vm1, %v243_v9 }
  0x48   : > { %2157 = vmatmul.mubr.msk.f32.gmra.mrb[6].mxu0 %vm251_vm1, %v244_v10 }
 0x10f   : > { %v2149_v17 = vpop.f32.mrb[0].mxu0 }
 0x110   : > { %v352_v18 = vadd.f32 %v2149_v17, %v2863_v16  ;;  %v346_v19 = vpop.f32.mrb[1].mxu0 }
 0x111   : > { %v347_v22 = vadd.f32 %v346_v19, %v2863_v16 }
 0x112   : > { %v2869_v23 = vmax.f32 %v352_v18, 0.0 }
 0x113   : > { %v2871_v24 = vmax.f32 %v347_v22, 0.0  ;;  %v2152_v25 = vpop.f32.mrb[2].mxu0 }
 0x114   : > { %v394_v26 = vmul.f32 %v2866_v21, %v2869_v23  ;;  %v356_v27 = vpop.f32.mrb[3].mxu0  ;;  %v442_v31 = vmul.f32 %v2875_v28, %v2869_v23  ;;  %v362_v35 = vadd.f32 %v2152_v25, %v2863_v16  ;;  %v490_v37 = vmul.f32 %v2881_v33, %v2869_v23 }
 0x115   : > { %v393_v29 = vmul.f32 %v2866_v21, %v2871_v24  ;;  %v441_v34 = vmul.f32 %v2875_v28, %v2871_v24  ;;  %v489_v40 = vmul.f32 %v2881_v33, %v2871_v24  ;;  %v357_v42 = vadd.f32 %v356_v27, %v2863_v16 }
 0x116   : > { %403 = vadd.xlane.f32.xlu1 %v394_v26  ;;  %v2892_v41 = vmax.f32 %v362_v35, 0.0  ;;  %v538_v43 = vmul.f32 %v2888_v39, %v2869_v23  ;;  %v537_v44 = vmul.f32 %v2888_v39, %v2871_v24 }
 0x117   : > { %401 = vadd.xlane.f32.xlu0 %v393_v29  ;;  %v2155_v30 = vpop.f32.mrb[4].mxu0  ;;  %v2901_v46 = vmax.f32 %v357_v42, 0.0 }
 0x118   : > { %v366_v32 = vpop.f32.mrb[5].mxu0  ;;  %v396_v45 = vmul.f32 %v2866_v21, %v2892_v41  ;;  %v444_v47 = vmul.f32 %v2875_v28, %v2892_v41  ;;  %v492_v48 = vmul.f32 %v2881_v33, %v2892_v41  ;;  %v372_v50 = vadd.f32 %v2155_v30, %v2863_v16 }
 0x119   : > { %v395_v49 = vmul.f32 %v2866_v21, %v2901_v46  ;;  %v540_v51 = vmul.f32 %v2888_v39, %v2892_v41  ;;  %v491_v52 = vmul.f32 %v2881_v33, %v2901_v46  ;;  %v367_v54 = vadd.f32 %v366_v32, %v2863_v16 }
 0x11a   : > { %451 = vadd.xlane.f32.xlu1 %v442_v31  ;;  %v2914_v53 = vmax.f32 %v372_v50, 0.0  ;;  %v443_v55 = vmul.f32 %v2875_v28, %v2901_v46  ;;  %v539_v56 = vmul.f32 %v2888_v39, %v2901_v46 }
 0x11b   : > { %449 = vadd.xlane.f32.xlu0 %v441_v34  ;;  %v2158_v36 = vpop.f32.mrb[6].mxu0  ;;  %v2923_v58 = vmax.f32 %v367_v54, 0.0 }
 0x11c   : > { %v376_v38 = vpop.f32.mrb[7].mxu0  ;;  %v398_v57 = vmul.f32 %v2866_v21, %v2914_v53  ;;  %v446_v59 = vmul.f32 %v2875_v28, %v2914_v53  ;;  %v494_v60 = vmul.f32 %v2881_v33, %v2914_v53  ;;  %v382_v62 = vadd.f32 %v2158_v36, %v2863_v16 }
 0x11d   : > { %v397_v61 = vmul.f32 %v2866_v21, %v2923_v58  ;;  %v542_v63 = vmul.f32 %v2888_v39, %v2914_v53  ;;  %v493_v0 = vmul.f32 %v2881_v33, %v2923_v58  ;;  %v377_v2 = vadd.f32 %v376_v38, %v2863_v16 }
 0x11e   : > { %499 = vadd.xlane.f32.xlu1 %v490_v37  ;;  %v2936_v1 = vmax.f32 %v382_v62, 0.0  ;;  %v445_v3 = vmul.f32 %v2875_v28, %v2923_v58  ;;  %v541_v4 = vmul.f32 %v2888_v39, %v2923_v58 }
 0x11f   : > { %497 = vadd.xlane.f32.xlu0 %v489_v40  ;;  %v2943_v5 = vmax.f32 %v377_v2, 0.0 }
 0x120   : > { %v400_v6 = vmul.f32 %v2866_v21, %v2936_v1  ;;  %v448_v7 = vmul.f32 %v2875_v28, %v2936_v1  ;;  %v496_v10 = vmul.f32 %v2881_v33, %v2936_v1  ;;  %v544_v13 = vmul.f32 %v2888_v39, %v2936_v1 }
 0x121   : > { %v447_v8 = vmul.f32 %v2875_v28, %v2943_v5  ;;  %v399_v9 = vmul.f32 %v2866_v21, %v2943_v5  ;;  %v495_v11 = vmul.f32 %v2881_v33, %v2943_v5  ;;  %v543_v14 = vmul.f32 %v2888_v39, %v2943_v5 }
 0x122   : > { %547 = vadd.xlane.f32.xlu1 %v538_v43 }
 0x123   : > { %545 = vadd.xlane.f32.xlu0 %v537_v44 }
 0x126   : > { %407 = vadd.xlane.f32.xlu1 %v396_v45 }
 0x127   : > { %455 = vadd.xlane.f32.xlu0 %v444_v47 }
 0x12a   : > { %503 = vadd.xlane.f32.xlu1 %v492_v48 }
 0x12b   : > { %405 = vadd.xlane.f32.xlu0 %v395_v49 }
 0x12e   : > { %551 = vadd.xlane.f32.xlu1 %v540_v51 }
 0x12f   : > { %501 = vadd.xlane.f32.xlu0 %v491_v52 }
 0x132   : > { %453 = vadd.xlane.f32.xlu1 %v443_v55 }
 0x133   : > { %549 = vadd.xlane.f32.xlu0 %v539_v56 }
 0x136   : > { %411 = vadd.xlane.f32.xlu1 %v398_v57 }
 0x137   : > { %459 = vadd.xlane.f32.xlu0 %v446_v59 }
 0x13a   : > { %507 = vadd.xlane.f32.xlu1 %v494_v60 }
 0x13b   : > { %409 = vadd.xlane.f32.xlu0 %v397_v61 }
 0x13e   : > { %555 = vadd.xlane.f32.xlu1 %v542_v63 }
 0x13f   : > { %505 = vadd.xlane.f32.xlu0 %v493_v0 }
 0x142   : > { %457 = vadd.xlane.f32.xlu1 %v445_v3 }
 0x143   : > { %553 = vadd.xlane.f32.xlu0 %v541_v4 }
 0x146   : > { %415 = vadd.xlane.f32.xlu1 %v400_v6 }
 0x147   : > { %463 = vadd.xlane.f32.xlu0 %v448_v7 }
 0x14a   : > { %461 = vadd.xlane.f32.xlu1 %v447_v8 }
 0x14b   : > { %413 = vadd.xlane.f32.xlu0 %v399_v9 }
 0x14e   : > { %511 = vadd.xlane.f32.xlu1 %v496_v10 }
 0x14f   : > { %509 = vadd.xlane.f32.xlu0 %v495_v11 }
 0x152   : > { %559 = vadd.xlane.f32.xlu1 %v544_v13 }
 0x153   : > { %557 = vadd.xlane.f32.xlu0 %v543_v14 }
 0x1a3   : > { %v404_v15 = vpop.xlane.xlu1 %403 }
 0x1a4   : > { %v402_v16 = vpop.xlane.xlu0 %401  ;;  %v418_v22 = vmul.f32 0.03125, %v404_v15 }
 0x1a5   : > { %v417_v25 = vmul.f32 0.03125, %v402_v16 }
 0x1a6   : > { %v426_v34 = vmul.f32 %v2866_v21, %v418_v22 }
 0x1a7   : > { %v452_v17 = vpop.xlane.xlu1 %451  ;;  %v425_v36 = vmul.f32 %v2866_v21, %v417_v25 }
 0x1a8   : > { %v466_v18 = vmul.f32 0.03125, %v452_v17  ;;  %v450_v19 = vpop.xlane.xlu0 %449 }
 0x1a9   : > { %v465_v20 = vmul.f32 0.03125, %v450_v19 }
 0x1aa   : > { %v474_v27 = vmul.f32 %v2875_v28, %v466_v18 }
 0x1ab   : > { %v500_v26 = vpop.xlane.xlu1 %499  ;;  %v473_v31 = vmul.f32 %v2875_v28, %v465_v20 }
 0x1ac   : > { %v514_v29 = vmul.f32 0.03125, %v500_v26  ;;  %v498_v30 = vpop.xlane.xlu0 %497  ;;  %v482_v40 = vadd.f32 %v474_v27, %v426_v34 }
 0x1ad   : > { %v513_v32 = vmul.f32 0.03125, %v498_v30  ;;  %v481_v44 = vadd.f32 %v473_v31, %v425_v36 }
 0x1ae   : > { %v522_v35 = vmul.f32 %v2881_v33, %v514_v29 }
 0x1af   : > { %v521_v37 = vmul.f32 %v2881_v33, %v513_v32  ;;  %v548_v38 = vpop.xlane.xlu1 %547 }
 0x1b0   : > { %v562_v42 = vmul.f32 0.03125, %v548_v38  ;;  %v546_v43 = vpop.xlane.xlu0 %545  ;;  %v530_v47 = vadd.f32 %v522_v35, %v482_v40 }
 0x1b1   : > { %v561_v45 = vmul.f32 0.03125, %v546_v43  ;;  %v529_v49 = vadd.f32 %v521_v37, %v481_v44 }
 0x1b2   : > { %v570_v48 = vmul.f32 %v2888_v39, %v562_v42 }
 0x1b3   : > { %v569_v50 = vmul.f32 %v2888_v39, %v561_v45  ;;  %v408_v51 = vpop.xlane.xlu1 %407 }
 0x1b4   : > { %v578_v52 = vadd.f32 %v570_v48, %v530_v47  ;;  %v420_v54 = vmul.f32 0.03125, %v408_v51  ;;  %v456_v55 = vpop.xlane.xlu0 %455 }
 0x1b5   : > { %v577_v56 = vadd.f32 %v569_v50, %v529_v49  ;;  %v468_v57 = vmul.f32 0.03125, %v456_v55 }
 0x1b6   : > { %v2970_v59 = vsub.f32 %v2869_v23, %v578_v52  ;;  %v428_v60 = vmul.f32 %v2866_v21, %v420_v54 }
 0x1b7   : > { %v2974_v61 = vsub.f32 %v2871_v24, %v577_v56  ;;  %v476_v62 = vmul.f32 %v2875_v28, %v468_v57  ;;  %v504_v63 = vpop.xlane.xlu1 %503 }
 0x1b8   : > { %v516_v0 = vmul.f32 0.03125, %v504_v63  ;;  %v406_v2 = vpop.xlane.xlu0 %405  ;;  %v594_v3 = vmul.f32 %v2970_v59, %v2970_v59 }
 0x1b9   : > { %v484_v4 = vadd.f32 %v476_v62, %v428_v60  ;;  %v593_v8 = vmul.f32 %v2974_v61, %v2974_v61  ;;  %v419_v11 = vmul.f32 0.03125, %v406_v2 }
 0x1ba   : > { %v524_v6 = vmul.f32 %v2881_v33, %v516_v0  ;;  %v666_v7 = vmul.f32 %v2875_v28, %v594_v3  ;;  %v602_v23 = vmul.f32 %v2866_v21, %v594_v3  ;;  %v730_v15 = vmul.f32 %v2881_v33, %v594_v3 }
 0x1bb   : > { %v552_v24 = vpop.xlane.xlu1 %551  ;;  %v601_v16 = vmul.f32 %v2866_v21, %v593_v8  ;;  %v427_v25 = vmul.f32 %v2866_v21, %v419_v11  ;;  %v794_v26 = vmul.f32 %v2888_v39, %v594_v3  ;;  %v729_v31 = vmul.f32 %v2881_v33, %v593_v8 }
 0x1bc   : > { %v564_v9 = vmul.f32 0.03125, %v552_v24  ;;  %675 = vadd.xlane.f32.xlu1 %v666_v7  ;;  %611 = vadd.xlane.f32.xlu0 %v602_v23  ;;  %v502_v10 = vpop.xlane.xlu0 %501  ;;  %v532_v13 = vadd.f32 %v524_v6, %v484_v4  ;;  %v665_v40 = vmul.f32 %v2875_v28, %v593_v8  ;;  %v793_v45 = vmul.f32 %v2888_v39, %v593_v8  ;;  %v865_v7 = vld [vmem:[#allocation2] sm:$0xff]  ;;  %v866_v23 = vld [vmem:[#allocation2 + $0x8] sm:$0xff] }
 0x1bd   : > { %v515_v19 = vmul.f32 0.03125, %v502_v10  ;;  %v2297_v24 = vpack.c.bf16 %v866_v23, %v865_v7  ;;  %v873_v23 = vld [vmem:[#allocation2 + $0x40] sm:$0xff] }
 0x1be   : > { %v572_v14 = vmul.f32 %v2888_v39, %v564_v9 }
 0x1bf   : > { %v454_v17 = vpop.xlane.xlu1 %453  ;;  %v523_v34 = vmul.f32 %v2881_v33, %v515_v19  ;;  %2298 = vmatprep.subr.bf16.mxu1 %v2297_v24 }
 0x1c0   : > { %v580_v18 = vadd.f32 %v572_v14, %v532_v13  ;;  %v467_v20 = vmul.f32 0.03125, %v454_v17  ;;  %739 = vadd.xlane.f32.xlu1 %v730_v15  ;;  %609 = vadd.xlane.f32.xlu0 %v601_v16  ;;  %v550_v22 = vpop.xlane.xlu0 %549 }
 0x1c1   : > { %v563_v30 = vmul.f32 0.03125, %v550_v22  ;;  %2300 = vmatpush3.bf16.msra.mxu1 %v2297_v24  ;;  %v868_v22 = vld [vmem:[#allocation2 + $0x18] sm:$0xff] }
 0x1c2   : > { %v2990_v27 = vsub.f32 %v2892_v41, %v580_v18  ;;  %v475_v29 = vmul.f32 %v2875_v28, %v467_v20  ;;  %v867_v20 = vld [vmem:[#allocation2 + $0x10] sm:$0xff] }
 0x1c3   : > { %v412_v32 = vpop.xlane.xlu1 %411  ;;  %v571_v43 = vmul.f32 %v2888_v39, %v563_v30 }
 0x1c4   : > { %v483_v35 = vadd.f32 %v475_v29, %v427_v25  ;;  %v422_v36 = vmul.f32 0.03125, %v412_v32  ;;  %803 = vadd.xlane.f32.xlu1 %v794_v26  ;;  %737 = vadd.xlane.f32.xlu0 %v729_v31  ;;  %v460_v37 = vpop.xlane.xlu0 %459  ;;  %v596_v41 = vmul.f32 %v2990_v27, %v2990_v27  ;;  %v2301_v26 = vpack.c.bf16 %v868_v22, %v867_v20 }
 0x1c5   : > { %v470_v38 = vmul.f32 0.03125, %v460_v37  ;;  %v869_v37 = vld [vmem:[#allocation2 + $0x20] sm:$0xff] }
 0x1c6   : > { %v531_v42 = vadd.f32 %v523_v34, %v483_v35  ;;  %v430_v44 = vmul.f32 %v2866_v21, %v422_v36  ;;  %v668_v52 = vmul.f32 %v2875_v28, %v596_v41  ;;  %v604_v57 = vmul.f32 %v2866_v21, %v596_v41  ;;  %2302 = vmatprep.subr.bf16.mxu1 %v2301_v26 }
 0x1c7   : > { %v478_v47 = vmul.f32 %v2875_v28, %v470_v38  ;;  %v508_v48 = vpop.xlane.xlu1 %507  ;;  %v796_v15 = vmul.f32 %v2888_v39, %v596_v41  ;;  %2304 = vmatpush3.bf16.msra.mxu1 %v2301_v26  ;;  %v870_v38 = vld [vmem:[#allocation2 + $0x28] sm:$0xff]  ;;  %v876_v26 = vld [vmem:[#allocation2 + $0x58] sm:$0xff] }
 0x1c8   : > { %v579_v49 = vadd.f32 %v571_v43, %v531_v42  ;;  %v518_v50 = vmul.f32 0.03125, %v508_v48  ;;  %673 = vadd.xlane.f32.xlu1 %v665_v40  ;;  %801 = vadd.xlane.f32.xlu0 %v793_v45  ;;  %v410_v51 = vpop.xlane.xlu0 %409 }
 0x1c9   : > { %v486_v55 = vadd.f32 %v478_v47, %v430_v44  ;;  %v421_v2 = vmul.f32 0.03125, %v410_v51 }
 0x1ca   : > { %v3004_v54 = vsub.f32 %v2901_v46, %v579_v49  ;;  %v526_v56 = vmul.f32 %v2881_v33, %v518_v50  ;;  %v732_v46 = vmul.f32 %v2881_v33, %v596_v41  ;;  %v2305_v41 = vpack.c.bf16 %v870_v38, %v869_v37  ;;  %v877_v37 = vld [vmem:[#allocation2 + $0x60] sm:$0xff]  ;;  %v878_v38 = vld [vmem:[#allocation2 + $0x68] sm:$0xff] }
 0x1cb   : > { %v556_v60 = vpop.xlane.xlu1 %555  ;;  %v429_v14 = vmul.f32 %v2866_v21, %v421_v2 }
 0x1cc   : > { %v566_v62 = vmul.f32 0.03125, %v556_v60  ;;  %679 = vadd.xlane.f32.xlu0 %v668_v52  ;;  %615 = vadd.xlane.f32.xlu1 %v604_v57  ;;  %v506_v63 = vpop.xlane.xlu0 %505  ;;  %v595_v0 = vmul.f32 %v3004_v54, %v3004_v54  ;;  %v534_v3 = vadd.f32 %v526_v56, %v486_v55  ;;  %v871_v52 = vld [vmem:[#allocation2 + $0x30] sm:$0xff]  ;;  %v872_v55 = vld [vmem:[#allocation2 + $0x38] sm:$0xff] }
 0x1cd   : > { %v517_v10 = vmul.f32 0.03125, %v506_v63  ;;  %2306 = vmatprep.subr.bf16.mxu1 %v2305_v41  ;;  %v2309_v57 = vpack.c.bf16 %v872_v55, %v871_v52 }
 0x1ce   : > { %v574_v4 = vmul.f32 %v2888_v39, %v566_v62  ;;  %v603_v6 = vmul.f32 %v2866_v21, %v595_v0  ;;  %v731_v19 = vmul.f32 %v2881_v33, %v595_v0  ;;  %v667_v32 = vmul.f32 %v2875_v28, %v595_v0  ;;  %2308 = vmatpush3.bf16.msra.mxu1 %v2305_v41 }
 0x1cf   : > { %v458_v8 = vpop.xlane.xlu1 %457  ;;  %v525_v29 = vmul.f32 %v2881_v33, %v517_v10  ;;  %v795_v35 = vmul.f32 %v2888_v39, %v595_v0  ;;  %2310 = vmatprep.subr.bf16.mxu1 %v2309_v57  ;;  %v2321_v41 = vpack.c.bf16 %v878_v38, %v877_v37 }
 0x1d0   : > { %v582_v9 = vadd.f32 %v574_v4, %v534_v3  ;;  %v469_v11 = vmul.f32 0.03125, %v458_v8  ;;  %743 = vadd.xlane.f32.xlu1 %v732_v46  ;;  %613 = vadd.xlane.f32.xlu0 %v603_v6  ;;  %v554_v13 = vpop.xlane.xlu0 %553  ;;  %v874_v8 = vld [vmem:[#allocation2 + $0x48] sm:$0xff] }
 0x1d1   : > { %v565_v18 = vmul.f32 0.03125, %v554_v13  ;;  %v2313_v10 = vpack.c.bf16 %v874_v8, %v873_v23 }
 0x1d2   : > { %v3016_v16 = vsub.f32 %v2914_v53, %v582_v9  ;;  %v477_v17 = vmul.f32 %v2875_v28, %v469_v11  ;;  %2312 = vmatpush3.bf16.msra.mxu1 %v2309_v57 }
 0x1d3   : > { %v416_v25 = vpop.xlane.xlu1 %415  ;;  %v573_v34 = vmul.f32 %v2888_v39, %v565_v18  ;;  %2314 = vmatprep.subr.bf16.mxu1 %v2313_v10 }
 0x1d4   : > { %v485_v30 = vadd.f32 %v477_v17, %v429_v14  ;;  %807 = vadd.xlane.f32.xlu1 %v796_v15  ;;  %741 = vadd.xlane.f32.xlu0 %v731_v19  ;;  %v464_v31 = vpop.xlane.xlu0 %463  ;;  %v598_v36 = vmul.f32 %v3016_v16, %v3016_v16  ;;  %v424_v43 = vmul.f32 0.03125, %v416_v25  ;;  %v875_v25 = vld [vmem:[#allocation2 + $0x50] sm:$0xff] }
 0x1d5   : > { %v472_v44 = vmul.f32 0.03125, %v464_v31  ;;  %v2317_v31 = vpack.c.bf16 %v876_v26, %v875_v25 }
 0x1d6   : > { %v533_v53 = vadd.f32 %v525_v29, %v485_v30  ;;  %v670_v50 = vmul.f32 %v2875_v28, %v598_v36  ;;  %v606_v51 = vmul.f32 %v2866_v21, %v598_v36  ;;  %v432_v60 = vmul.f32 %v2866_v21, %v424_v43  ;;  %2316 = vmatpush3.bf16.msra.mxu1 %v2313_v10 }
 0x1d7   : > { %v462_v40 = vpop.xlane.xlu1 %461  ;;  %v480_v62 = vmul.f32 %v2875_v28, %v472_v44  ;;  %v734_v6 = vmul.f32 %v2881_v33, %v598_v36  ;;  %v798_v20 = vmul.f32 %v2888_v39, %v598_v36  ;;  %2318 = vmatprep.subr.bf16.mxu1 %v2317_v31 }
 0x1d8   : > { %v581_v42 = vadd.f32 %v573_v34, %v533_v53  ;;  %677 = vadd.xlane.f32.xlu1 %v667_v32  ;;  %805 = vadd.xlane.f32.xlu0 %v795_v35  ;;  %v414_v45 = vpop.xlane.xlu0 %413  ;;  %v471_v47 = vmul.f32 0.03125, %v462_v40 }
 0x1d9   : > { %v423_v48 = vmul.f32 0.03125, %v414_v45  ;;  %v488_v11 = vadd.f32 %v480_v62, %v432_v60  ;;  %v879_v45 = vld [vmem:[#allocation2 + $0x70] sm:$0xff] }
 0x1da   : > { %v3027_v49 = vsub.f32 %v2923_v58, %v581_v42  ;;  %v479_v2 = vmul.f32 %v2875_v28, %v471_v47  ;;  %2320 = vmatpush3.bf16.msra.mxu1 %v2317_v31  ;;  %v880_v47 = vld [vmem:[#allocation2 + $0x78] sm:$0xff] }
 0x1db   : > { %v512_v56 = vpop.xlane.xlu1 %511  ;;  %v431_v3 = vmul.f32 %v2866_v21, %v423_v48  ;;  %2322 = vmatprep.subr.bf16.mxu1 %v2321_v41 }
 0x1dc   : > { %v520_v63 = vmul.f32 0.03125, %v512_v56  ;;  %683 = vadd.xlane.f32.xlu0 %v670_v50  ;;  %619 = vadd.xlane.f32.xlu1 %v606_v51  ;;  %v510_v0 = vpop.xlane.xlu0 %509  ;;  %v597_v58 = vmul.f32 %v3027_v49, %v3027_v49 }
 0x1dd   : > { %v519_v4 = vmul.f32 0.03125, %v510_v0  ;;  %v487_v15 = vadd.f32 %v479_v2, %v431_v3 }
 0x1de   : > { %v528_v46 = vmul.f32 %v2881_v33, %v520_v63  ;;  %v605_v7 = vmul.f32 %v2866_v21, %v597_v58  ;;  %v733_v22 = vmul.f32 %v2881_v33, %v597_v58  ;;  %v669_v35 = vmul.f32 %v2875_v28, %v597_v58  ;;  %2324 = vmatpush3.bf16.msra.mxu1 %v2321_v41 }
 0x1df   : > { %v527_v24 = vmul.f32 %v2881_v33, %v519_v4  ;;  %v560_v9 = vpop.xlane.xlu1 %559  ;;  %v797_v36 = vmul.f32 %v2888_v39, %v597_v58 }
 0x1e0   : > { %v568_v13 = vmul.f32 0.03125, %v560_v9  ;;  %747 = vadd.xlane.f32.xlu1 %v734_v6  ;;  %617 = vadd.xlane.f32.xlu0 %v605_v7  ;;  %v558_v14 = vpop.xlane.xlu0 %557  ;;  %v536_v18 = vadd.f32 %v528_v46, %v488_v11 }
 0x1e1   : > { %v567_v17 = vmul.f32 0.03125, %v558_v14  ;;  %v535_v29 = vadd.f32 %v527_v24, %v487_v15 }
 0x1e2   : > { %v576_v19 = vmul.f32 %v2888_v39, %v568_v13 }
 0x1e3   : > { %v575_v30 = vmul.f32 %v2888_v39, %v567_v17 }
 0x1e4   : > { %v584_v32 = vadd.f32 %v576_v19, %v536_v18  ;;  %811 = vadd.xlane.f32.xlu1 %v798_v20  ;;  %745 = vadd.xlane.f32.xlu0 %v733_v22 }
 0x1e5   : > { %v583_v53 = vadd.f32 %v575_v30, %v535_v29 }
 0x1e6   : > { %v3046_v34 = vsub.f32 %v2936_v1, %v584_v32 }
 0x1e7   : > { %v3051_v40 = vsub.f32 %v2943_v5, %v583_v53  ;;  %v2325_v5 = vpack.c.bf16 %v880_v47, %v879_v45 }
 0x1e8   : > { %681 = vadd.xlane.f32.xlu1 %v669_v35  ;;  %809 = vadd.xlane.f32.xlu0 %v797_v36  ;;  %v600_v42 = vmul.f32 %v3046_v34, %v3046_v34 }
 0x1e9   : > { %v599_v44 = vmul.f32 %v3051_v40, %v3051_v40  ;;  %2326 = vmatprep.subr.bf16.mxu1 %v2325_v5 }
 0x1ea   : > { %v672_v1 = vmul.f32 %v2875_v28, %v600_v42  ;;  %v608_v43 = vmul.f32 %v2866_v21, %v600_v42  ;;  %2328 = vmatpush3.bf16.msra.mxu1 %v2325_v5  ;;  %v736_v51 = vmul.f32 %v2881_v33, %v600_v42  ;;  %v800_v55 = vmul.f32 %v2888_v39, %v600_v42 }
 0x1eb   : > { %v671_v48 = vmul.f32 %v2875_v28, %v599_v44  ;;  %v607_v50 = vmul.f32 %v2866_v21, %v599_v44  ;;  %v735_v52 = vmul.f32 %v2881_v33, %v599_v44  ;;  %v799_v56 = vmul.f32 %v2888_v39, %v599_v44 }
 0x1ec   : > { %687 = vadd.xlane.f32.xlu0 %v672_v1  ;;  %623 = vadd.xlane.f32.xlu1 %v608_v43 }
 0x1f0   : > { %685 = vadd.xlane.f32.xlu1 %v671_v48  ;;  %621 = vadd.xlane.f32.xlu0 %v607_v50 }
 0x1f4   : > { %751 = vadd.xlane.f32.xlu1 %v736_v51  ;;  %749 = vadd.xlane.f32.xlu0 %v735_v52 }
 0x1f8   : > { %815 = vadd.xlane.f32.xlu1 %v800_v55  ;;  %813 = vadd.xlane.f32.xlu0 %v799_v56 }
 0x249   : > { %v676_v57 = vpop.xlane.xlu1 %675  ;;  %v612_v60 = vpop.xlane.xlu0 %611 }
 0x24a   : > { %v690_v62 = vmul.f32 0.03125, %v676_v57  ;;  %v626_v63 = vmul.f32 0.03125, %v612_v60 }
 0x24c   : > { %v698_v3 = vadd.f32 1e-05, %v690_v62  ;;  %v634_v46 = vadd.f32 1e-05, %v626_v63 }
 0x24d   : > { %v740_v0 = vpop.xlane.xlu1 %739  ;;  %v610_v58 = vpop.xlane.xlu0 %609 }
 0x24e   : > { %v754_v2 = vmul.f32 0.03125, %v740_v0  ;;  %v625_v4 = vmul.f32 0.03125, %v610_v58  ;;  %2465 = vrsqrt.f32 %v698_v3 }
 0x24f   : > { %2467 = vrsqrt.f32 %v634_v46 }
 0x250   : > { %v762_v23 = vadd.f32 1e-05, %v754_v2  ;;  %v633_v9 = vadd.f32 1e-05, %v625_v4 }
 0x251   : > { %v804_v6 = vpop.xlane.xlu1 %803  ;;  %v738_v7 = vpop.xlane.xlu0 %737 }
 0x252   : > { %v818_v8 = vmul.f32 0.03125, %v804_v6  ;;  %v753_v24 = vmul.f32 0.03125, %v738_v7  ;;  %2469 = vrsqrt.f32 %v762_v23 }
 0x253   : > { %2471 = vrsqrt.f32 %v633_v9 }
 0x254   : > { %v826_v10 = vadd.f32 1e-05, %v818_v8  ;;  %v761_v11 = vadd.f32 1e-05, %v753_v24 }
 0x255   : > { %v674_v13 = vpop.xlane.xlu1 %673  ;;  %v802_v14 = vpop.xlane.xlu0 %801 }
 0x256   : > { %v689_v15 = vmul.f32 0.03125, %v674_v13  ;;  %v817_v17 = vmul.f32 0.03125, %v802_v14  ;;  %2473 = vrsqrt.f32 %v826_v10 }
 0x257   : > { %2475 = vrsqrt.f32 %v761_v11 }
 0x258   : > { %v697_v18 = vadd.f32 1e-05, %v689_v15  ;;  %v825_v19 = vadd.f32 1e-05, %v817_v17  ;;  %v2466_v29 = vpop.eup %2465 }
 0x259   : > { %v616_v20 = vpop.xlane.xlu1 %615  ;;  %v680_v22 = vpop.xlane.xlu0 %679  ;;  %v714_v44 = vmul.f32 %v2466_v29, %v2875_v28 }
 0x25a   : > { %2477 = vrsqrt.f32 %v697_v18  ;;  %v628_v25 = vmul.f32 0.03125, %v616_v20  ;;  %v692_v26 = vmul.f32 0.03125, %v680_v22  ;;  %v2468_v32 = vpop.eup %2467 }
 0x25b   : > { %2479 = vrsqrt.f32 %v825_v19  ;;  %v650_v43 = vmul.f32 %v2468_v32, %v2866_v21 }
 0x25c   : > { %v636_v35 = vadd.f32 1e-05, %v628_v25  ;;  %v2470_v37 = vpop.eup %2469  ;;  %v700_v38 = vadd.f32 1e-05, %v692_v26 }
 0x25d   : > { %v744_v30 = vpop.xlane.xlu1 %743  ;;  %v614_v31 = vpop.xlane.xlu0 %613  ;;  %v778_v56 = vmul.f32 %v2470_v37, %v2881_v33  ;;  %v722_v58 = vadd.f32 %v714_v44, %v650_v43 }
 0x25e   : > { %v756_v53 = vmul.f32 0.03125, %v744_v30  ;;  %v627_v36 = vmul.f32 0.03125, %v614_v31  ;;  %v2472_v41 = vpop.eup %2471  ;;  %2481 = vrsqrt.f32 %v636_v35 }
 0x25f   : > { %2483 = vrsqrt.f32 %v700_v38  ;;  %v649_v63 = vmul.f32 %v2472_v41, %v2866_v21  ;;  %v786_v24 = vadd.f32 %v778_v56, %v722_v58 }
 0x260   : > { %v2474_v45 = vpop.eup %2473  ;;  %v764_v47 = vadd.f32 1e-05, %v756_v53  ;;  %v635_v51 = vadd.f32 1e-05, %v627_v36 }
 0x261   : > { %v808_v42 = vpop.xlane.xlu1 %807  ;;  %v742_v1 = vpop.xlane.xlu0 %741  ;;  %v842_v46 = vmul.f32 %v2474_v45, %v2888_v39 }
 0x262   : > { %v820_v5 = vmul.f32 0.03125, %v808_v42  ;;  %v755_v48 = vmul.f32 0.03125, %v742_v1  ;;  %v2476_v50 = vpop.eup %2475  ;;  %2485 = vrsqrt.f32 %v764_v47 }
 0x263   : > { %2487 = vrsqrt.f32 %v635_v51  ;;  %v777_v7 = vmul.f32 %v2476_v50, %v2881_v33  ;;  %v850_v14 = vadd.f32 %v842_v46, %v786_v24 }
 0x264   : > { %v2478_v52 = vpop.eup %2477  ;;  %v828_v55 = vadd.f32 1e-05, %v820_v5  ;;  %v763_v57 = vadd.f32 1e-05, %v755_v48 }
 0x265   : > { %v678_v60 = vpop.xlane.xlu1 %677  ;;  %v806_v62 = vpop.xlane.xlu0 %805  ;;  %v713_v0 = vmul.f32 %v2478_v52, %v2875_v28  ;;  %v858_v30 = vmul.f32 %v850_v14, %v2970_v59 }
 0x266   : > { %v2480_v2 = vpop.eup %2479  ;;  %v691_v3 = vmul.f32 0.03125, %v678_v60  ;;  %v819_v4 = vmul.f32 0.03125, %v806_v62  ;;  %2489 = vrsqrt.f32 %v828_v55 }
 0x267   : > { %v721_v6 = vadd.f32 %v713_v0, %v649_v63  ;;  %2491 = vrsqrt.f32 %v763_v57  ;;  %v841_v13 = vmul.f32 %v2480_v2, %v2888_v39 }
 0x268   : > { %v699_v23 = vadd.f32 1e-05, %v691_v3  ;;  %v827_v8 = vadd.f32 1e-05, %v819_v4  ;;  %v2482_v19 = vpop.eup %2481 }
 0x269   : > { %v620_v9 = vpop.xlane.xlu1 %619  ;;  %v684_v10 = vpop.xlane.xlu0 %683  ;;  %v785_v11 = vadd.f32 %v777_v7, %v721_v6  ;;  %v652_v41 = vmul.f32 %v2482_v19, %v2866_v21 }
 0x26a   : > { %2493 = vrsqrt.f32 %v699_v23  ;;  %v630_v15 = vmul.f32 0.03125, %v620_v9  ;;  %v694_v18 = vmul.f32 0.03125, %v684_v10  ;;  %v2484_v26 = vpop.eup %2483 }
 0x26b   : > { %v849_v17 = vadd.f32 %v841_v13, %v785_v11  ;;  %2495 = vrsqrt.f32 %v827_v8  ;;  %v716_v42 = vmul.f32 %v2484_v26, %v2875_v28 }
 0x26c   : > { %v638_v31 = vadd.f32 1e-05, %v630_v15  ;;  %v2486_v53 = vpop.eup %2485  ;;  %v702_v35 = vadd.f32 1e-05, %v694_v18 }
 0x26d   : > { %v748_v20 = vpop.xlane.xlu1 %747  ;;  %v618_v22 = vpop.xlane.xlu0 %617  ;;  %v857_v25 = vmul.f32 %v849_v17, %v2974_v61  ;;  %v780_v48 = vmul.f32 %v2486_v53, %v2881_v33  ;;  %v724_v57 = vadd.f32 %v716_v42, %v652_v41 }
 0x26e   : > { %v758_v29 = vmul.f32 0.03125, %v748_v20  ;;  %v629_v32 = vmul.f32 0.03125, %v618_v22  ;;  %v2488_v36 = vpop.eup %2487  ;;  %2497 = vrsqrt.f32 %v638_v31 }
 0x26f   : > { %2191 = vmatprep.mubr.f32.mxu1 %v857_v25  ;;  %2499 = vrsqrt.f32 %v702_v35  ;;  %v651_v55 = vmul.f32 %v2488_v36, %v2866_v21  ;;  %v788_v46 = vadd.f32 %v780_v48, %v724_v57 }
 0x270   : > { %2192 = vmatmul.mubr.f32.vlgmr.msra.gmra.mrb[0].mxu1 %v858_v30  ;;  %v2490_v1 = vpop.eup %2489  ;;  %v766_v43 = vadd.f32 1e-05, %v758_v29  ;;  %v637_v59 = vadd.f32 1e-05, %v629_v32 }
 0x271   : > { %v812_v37 = vpop.xlane.xlu1 %811  ;;  %v746_v38 = vpop.xlane.xlu0 %745  ;;  %v844_v0 = vmul.f32 %v2490_v1, %v2888_v39 }
 0x272   : > { %v822_v61 = vmul.f32 0.03125, %v812_v37  ;;  %v757_v44 = vmul.f32 0.03125, %v746_v38  ;;  %v2492_v45 = vpop.eup %2491  ;;  %2501 = vrsqrt.f32 %v766_v43 }
 0x273   : > { %2503 = vrsqrt.f32 %v637_v59  ;;  %v779_v2 = vmul.f32 %v2492_v45, %v2881_v33  ;;  %v852_v10 = vadd.f32 %v844_v0, %v788_v46 }
 0x274   : > { %v2494_v47 = vpop.eup %2493  ;;  %v830_v5 = vadd.f32 1e-05, %v822_v61  ;;  %v765_v50 = vadd.f32 1e-05, %v757_v44 }
 0x275   : > { %v682_v51 = vpop.xlane.xlu1 %681  ;;  %v810_v52 = vpop.xlane.xlu0 %809  ;;  %v715_v56 = vmul.f32 %v2494_v47, %v2875_v28  ;;  %v860_v26 = vmul.f32 %v852_v10, %v2990_v27 }
 0x276   : > { %v2496_v60 = vpop.eup %2495  ;;  %v693_v62 = vmul.f32 0.03125, %v682_v51  ;;  %v821_v63 = vmul.f32 0.03125, %v810_v52  ;;  %2505 = vrsqrt.f32 %v830_v5 }
 0x277   : > { %v723_v58 = vadd.f32 %v715_v56, %v651_v55  ;;  %2507 = vrsqrt.f32 %v765_v50  ;;  %v843_v8 = vmul.f32 %v2496_v60, %v2888_v39 }
 0x278   : > { %v701_v3 = vadd.f32 1e-05, %v693_v62  ;;  %v829_v4 = vadd.f32 1e-05, %v821_v63  ;;  %v2498_v14 = vpop.eup %2497 }
 0x279   : > { %v624_v6 = vpop.xlane.xlu1 %623  ;;  %v688_v7 = vpop.xlane.xlu0 %687  ;;  %v787_v23 = vadd.f32 %v779_v2, %v723_v58  ;;  %v654_v36 = vmul.f32 %v2498_v14, %v2866_v21 }
 0x27a   : > { %2509 = vrsqrt.f32 %v701_v3  ;;  %v632_v24 = vmul.f32 0.03125, %v624_v6  ;;  %v696_v9 = vmul.f32 0.03125, %v688_v7  ;;  %v2500_v20 = vpop.eup %2499 }
 0x27b   : > { %v851_v11 = vadd.f32 %v843_v8, %v787_v23  ;;  %2511 = vrsqrt.f32 %v829_v4  ;;  %v718_v37 = vmul.f32 %v2500_v20, %v2875_v28 }
 0x27c   : > { %v640_v13 = vadd.f32 1e-05, %v632_v24  ;;  %v704_v15 = vadd.f32 1e-05, %v696_v9  ;;  %v2502_v29 = vpop.eup %2501 }
 0x27d   : > { %v686_v17 = vpop.xlane.xlu1 %685  ;;  %v622_v18 = vpop.xlane.xlu0 %621  ;;  %v859_v19 = vmul.f32 %v851_v11, %v3004_v54  ;;  %v782_v61 = vmul.f32 %v2502_v29, %v2881_v33  ;;  %v726_v5 = vadd.f32 %v718_v37, %v654_v36 }
 0x27e   : > { %v695_v22 = vmul.f32 0.03125, %v686_v17  ;;  %v631_v25 = vmul.f32 0.03125, %v622_v18  ;;  %2513 = vrsqrt.f32 %v640_v13  ;;  %v2504_v32 = vpop.eup %2503 }
 0x27f   : > { %2194 = vmatprep.mubr.f32.mxu1 %v859_v19  ;;  %2515 = vrsqrt.f32 %v704_v15  ;;  %v653_v59 = vmul.f32 %v2504_v32, %v2866_v21  ;;  %v790_v62 = vadd.f32 %v782_v61, %v726_v5  ;;  %v883_v32 = vsub.s32 1, %v2857_v12 }
 0x280   : > { %v703_v30 = vadd.f32 1e-05, %v695_v22  ;;  %v639_v31 = vadd.f32 1e-05, %v631_v25  ;;  %2195 = vmatmul.mubr.f32.gmra.mrb[2].mxu1 %v860_v26  ;;  %v2506_v54 = vpop.eup %2505 }
 0x281   : > { %v752_v53 = vpop.xlane.xlu1 %751  ;;  %v750_v35 = vpop.xlane.xlu0 %749  ;;  %v846_v52 = vmul.f32 %v2506_v54, %v2888_v39 }
 0x282   : > { %2517 = vrsqrt.f32 %v703_v30  ;;  %v760_v38 = vmul.f32 0.03125, %v752_v53  ;;  %v759_v41 = vmul.f32 0.03125, %v750_v35  ;;  %v2508_v42 = vpop.eup %2507  ;;  %v2625_v53 = vld [vmem:[%s3528_s3] sm:$0xff] }
 0x283   : > { %2519 = vrsqrt.f32 %v639_v31  ;;  %v781_v56 = vmul.f32 %v2508_v42, %v2881_v33  ;;  %v854_v2 = vadd.f32 %v846_v52, %v790_v62  ;;  %v3109_v35 = vrot.slane %v2625_v53, %v883_v32 }
 0x284   : > { %v2510_v27 = vpop.eup %2509  ;;  %v768_v1 = vadd.f32 1e-05, %v760_v38  ;;  %v767_v43 = vadd.f32 1e-05, %v759_v41 }
 0x285   : > { %v816_v44 = vpop.xlane.xlu1 %815  ;;  %v814_v45 = vpop.xlane.xlu0 %813  ;;  %v717_v47 = vmul.f32 %v2510_v27, %v2875_v28  ;;  %v862_v23 = vmul.f32 %v854_v2, %v3016_v16 }
 0x286   : > { %v2512_v48 = vpop.eup %2511  ;;  %2521 = vrsqrt.f32 %v768_v1  ;;  %v824_v50 = vmul.f32 0.03125, %v816_v44  ;;  %v823_v51 = vmul.f32 0.03125, %v814_v45 }
 0x287   : > { %2523 = vrsqrt.f32 %v767_v43  ;;  %v725_v55 = vadd.f32 %v717_v47, %v653_v59  ;;  %v845_v0 = vmul.f32 %v2512_v48, %v2888_v39 }
 0x288   : > { %v832_v57 = vadd.f32 1e-05, %v824_v50  ;;  %v831_v60 = vadd.f32 1e-05, %v823_v51  ;;  %v2514_v58 = vpop.eup %2513 }
 0x289   : > { %v789_v63 = vadd.f32 %v781_v56, %v725_v55  ;;  %v2516_v3 = vpop.eup %2515  ;;  %v656_v8 = vmul.f32 %v2514_v58, %v2866_v21 }
 0x28a   : > { %2525 = vrsqrt.f32 %v832_v57  ;;  %v720_v24 = vmul.f32 %v2516_v3, %v2875_v28 }
 0x28b   : > { %2527 = vrsqrt.f32 %v831_v60  ;;  %v853_v4 = vadd.f32 %v845_v0, %v789_v63 }
 0x28c   : > { %v2518_v46 = vpop.eup %2517  ;;  %v728_v17 = vadd.f32 %v720_v24, %v656_v8 }
 0x28d   : > { %v2520_v6 = vpop.eup %2519  ;;  %v861_v7 = vmul.f32 %v853_v4, %v3027_v49  ;;  %v719_v11 = vmul.f32 %v2518_v46, %v2875_v28 }
 0x28e   : > { %v655_v10 = vmul.f32 %v2520_v6, %v2866_v21 }
 0x28f   : > { %2197 = vmatprep.mubr.f32.mxu1 %v861_v7 }
 0x290   : > { %v2522_v9 = vpop.eup %2521  ;;  %2198 = vmatmul.mubr.f32.gmra.mrb[4].mxu1 %v862_v23  ;;  %v727_v18 = vadd.f32 %v719_v11, %v655_v10 }
 0x291   : > { %v2524_v13 = vpop.eup %2523  ;;  %v784_v14 = vmul.f32 %v2522_v9, %v2881_v33 }
 0x292   : > { %v783_v15 = vmul.f32 %v2524_v13, %v2881_v33 }
 0x293   : > { %v792_v19 = vadd.f32 %v784_v14, %v728_v17 }
 0x294   : > { %v2526_v49 = vpop.eup %2525  ;;  %v791_v22 = vadd.f32 %v783_v15, %v727_v18 }
 0x295   : > { %v2528_v16 = vpop.eup %2527  ;;  %v848_v20 = vmul.f32 %v2526_v49, %v2888_v39 }
 0x296   : > { %v847_v25 = vmul.f32 %v2528_v16, %v2888_v39 }
 0x297   : > { %v856_v26 = vadd.f32 %v848_v20, %v792_v19 }
 0x298   : > { %v855_v29 = vadd.f32 %v847_v25, %v791_v22 }
 0x299   : > { %v864_v30 = vmul.f32 %v856_v26, %v3046_v34 }
 0x29a   : > { %v863_v31 = vmul.f32 %v855_v29, %v3051_v40 }
 0x29c   : > { %2200 = vmatprep.mubr.f32.mxu1 %v863_v31 }
 0x29d   : > { %2201 = vmatmul.mubr.f32.gmra.mrb[6].mxu1 %v864_v30 }
 0x343   : > { %v2193_v36 = vpop.f32.mrb[0].mxu1 }
 0x344   : > { %v957_v37 = vadd.f32 %v2193_v36, %v3109_v35  ;;  %v951_v54 = vpop.f32.mrb[1].mxu1 }
 0x345   : > { %v952_v38 = vadd.f32 %v951_v54, %v3109_v35 }
 0x346   : > { %v3113_v41 = vmax.f32 %v957_v37, 0.0 }
 0x347   : > { %v3115_v34 = vmax.f32 %v952_v38, 0.0 }
 0x348   : > { %v1047_v40 = vmul.f32 %v2875_v28, %v3113_v41  ;;  %v999_v42 = vmul.f32 %v2866_v21, %v3113_v41  ;;  %v1095_v27 = vmul.f32 %v2881_v33, %v3113_v41  ;;  %v1143_v43 = vmul.f32 %v2888_v39, %v3113_v41 }
 0x349   : > { %v998_v1 = vmul.f32 %v2866_v21, %v3115_v34  ;;  %v1094_v61 = vmul.f32 %v2881_v33, %v3115_v34  ;;  %v1046_v47 = vmul.f32 %v2875_v28, %v3115_v34  ;;  %v1142_v5 = vmul.f32 %v2888_v39, %v3115_v34 }
 0x34a   : > { %1056 = vadd.xlane.f32.xlu1 %v1047_v40  ;;  %1008 = vadd.xlane.f32.xlu0 %v999_v42 }
 0x34e   : > { %1104 = vadd.xlane.f32.xlu1 %v1095_v27  ;;  %1006 = vadd.xlane.f32.xlu0 %v998_v1 }
 0x352   : > { %1152 = vadd.xlane.f32.xlu1 %v1143_v43  ;;  %1102 = vadd.xlane.f32.xlu0 %v1094_v61 }
 0x353   : > { %v2196_v44 = vpop.f32.mrb[2].mxu1 }
 0x354   : > { %v967_v45 = vadd.f32 %v2196_v44, %v3109_v35  ;;  %v961_v59 = vpop.f32.mrb[3].mxu1 }
 0x355   : > { %v962_v48 = vadd.f32 %v961_v59, %v3109_v35 }
 0x356   : > { %v3135_v50 = vmax.f32 %v967_v45, 0.0  ;;  %1054 = vadd.xlane.f32.xlu1 %v1046_v47  ;;  %1150 = vadd.xlane.f32.xlu0 %v1142_v5 }
 0x357   : > { %v3137_v51 = vmax.f32 %v962_v48, 0.0 }
 0x358   : > { %v1049_v52 = vmul.f32 %v2875_v28, %v3135_v50  ;;  %v1001_v55 = vmul.f32 %v2866_v21, %v3135_v50  ;;  %v1097_v56 = vmul.f32 %v2881_v33, %v3135_v50  ;;  %v1145_v60 = vmul.f32 %v2888_v39, %v3135_v50 }
 0x359   : > { %v1000_v57 = vmul.f32 %v2866_v21, %v3137_v51  ;;  %v1096_v62 = vmul.f32 %v2881_v33, %v3137_v51  ;;  %v1048_v2 = vmul.f32 %v2875_v28, %v3137_v51  ;;  %v1144_v3 = vmul.f32 %v2888_v39, %v3137_v51 }
 0x35a   : > { %1060 = vadd.xlane.f32.xlu0 %v1049_v52  ;;  %1012 = vadd.xlane.f32.xlu1 %v1001_v55 }
 0x35e   : > { %1108 = vadd.xlane.f32.xlu1 %v1097_v56  ;;  %1010 = vadd.xlane.f32.xlu0 %v1000_v57 }
 0x362   : > { %1156 = vadd.xlane.f32.xlu1 %v1145_v60  ;;  %1106 = vadd.xlane.f32.xlu0 %v1096_v62 }
 0x363   : > { %v2199_v63 = vpop.f32.mrb[4].mxu1 }
 0x364   : > { %v977_v0 = vadd.f32 %v2199_v63, %v3109_v35  ;;  %v971_v58 = vpop.f32.mrb[5].mxu1 }
 0x365   : > { %v972_v4 = vadd.f32 %v971_v58, %v3109_v35 }
 0x366   : > { %v3157_v46 = vmax.f32 %v977_v0, 0.0  ;;  %1058 = vadd.xlane.f32.xlu1 %v1048_v2  ;;  %1154 = vadd.xlane.f32.xlu0 %v1144_v3 }
 0x367   : > { %v3159_v6 = vmax.f32 %v972_v4, 0.0 }
 0x368   : > { %v1051_v7 = vmul.f32 %v2875_v28, %v3157_v46  ;;  %v1003_v23 = vmul.f32 %v2866_v21, %v3157_v46  ;;  %v1099_v8 = vmul.f32 %v2881_v33, %v3157_v46  ;;  %v1147_v10 = vmul.f32 %v2888_v39, %v3157_v46 }
 0x369   : > { %v1002_v24 = vmul.f32 %v2866_v21, %v3159_v6  ;;  %v1098_v11 = vmul.f32 %v2881_v33, %v3159_v6  ;;  %v1050_v49 = vmul.f32 %v2875_v28, %v3159_v6  ;;  %v1146_v18 = vmul.f32 %v2888_v39, %v3159_v6 }
 0x36a   : > { %1064 = vadd.xlane.f32.xlu0 %v1051_v7  ;;  %1016 = vadd.xlane.f32.xlu1 %v1003_v23 }
 0x36e   : > { %1112 = vadd.xlane.f32.xlu1 %v1099_v8  ;;  %1014 = vadd.xlane.f32.xlu0 %v1002_v24 }
 0x370   : > { %v2202_v9 = vpop.f32.mrb[6].mxu1 }
 0x371   : > { %v987_v13 = vadd.f32 %v2202_v9, %v3109_v35  ;;  %v981_v14 = vpop.f32.mrb[7].mxu1 }
 0x372   : > { %1160 = vadd.xlane.f32.xlu1 %v1147_v10  ;;  %1110 = vadd.xlane.f32.xlu0 %v1098_v11  ;;  %v982_v17 = vadd.f32 %v981_v14, %v3109_v35 }
 0x373   : > { %v3174_v15 = vmax.f32 %v987_v13, 0.0 }
 0x374   : > { %v3181_v16 = vmax.f32 %v982_v17, 0.0 }
 0x375   : > { %v1053_v19 = vmul.f32 %v2875_v28, %v3174_v15  ;;  %v1005_v20 = vmul.f32 %v2866_v21, %v3174_v15  ;;  %v1101_v26 = vmul.f32 %v2881_v33, %v3174_v15  ;;  %v1149_v30 = vmul.f32 %v2888_v39, %v3174_v15 }
 0x376   : > { %1062 = vadd.xlane.f32.xlu1 %v1050_v49  ;;  %1158 = vadd.xlane.f32.xlu0 %v1146_v18  ;;  %v1052_v22 = vmul.f32 %v2875_v28, %v3181_v16  ;;  %v1004_v25 = vmul.f32 %v2866_v21, %v3181_v16  ;;  %v1100_v29 = vmul.f32 %v2881_v33, %v3181_v16 }
 0x377   : > { %v1148_v31 = vmul.f32 %v2888_v39, %v3181_v16 }
 0x37a   : > { %1068 = vadd.xlane.f32.xlu0 %v1053_v19  ;;  %1020 = vadd.xlane.f32.xlu1 %v1005_v20 }
 0x37e   : > { %1066 = vadd.xlane.f32.xlu1 %v1052_v22  ;;  %1018 = vadd.xlane.f32.xlu0 %v1004_v25 }
 0x382   : > { %1116 = vadd.xlane.f32.xlu1 %v1101_v26  ;;  %1114 = vadd.xlane.f32.xlu0 %v1100_v29 }
 0x386   : > { %1164 = vadd.xlane.f32.xlu1 %v1149_v30  ;;  %1162 = vadd.xlane.f32.xlu0 %v1148_v31 }
 0x3d7   : > { %v1057_v32 = vpop.xlane.xlu1 %1056  ;;  %v1009_v53 = vpop.xlane.xlu0 %1008 }
 0x3d8   : > { %v1071_v35 = vmul.f32 0.03125, %v1057_v32  ;;  %v1023_v36 = vmul.f32 0.03125, %v1009_v53 }
 0x3da   : > { %v1079_v38 = vmul.f32 %v2875_v28, %v1071_v35  ;;  %v1031_v40 = vmul.f32 %v2866_v21, %v1023_v36 }
 0x3db   : > { %v1105_v37 = vpop.xlane.xlu1 %1104  ;;  %v1007_v54 = vpop.xlane.xlu0 %1006 }
 0x3dc   : > { %v1119_v42 = vmul.f32 0.03125, %v1105_v37  ;;  %v1087_v61 = vadd.f32 %v1079_v38, %v1031_v40  ;;  %v1022_v59 = vmul.f32 0.03125, %v1007_v54 }
 0x3de   : > { %v1127_v27 = vmul.f32 %v2881_v33, %v1119_v42  ;;  %v1030_v57 = vmul.f32 %v2866_v21, %v1022_v59 }
 0x3df   : > { %v1153_v1 = vpop.xlane.xlu1 %1152  ;;  %v1103_v43 = vpop.xlane.xlu0 %1102 }
 0x3e0   : > { %v1167_v44 = vmul.f32 0.03125, %v1153_v1  ;;  %v1135_v45 = vadd.f32 %v1127_v27, %v1087_v61  ;;  %v1118_v5 = vmul.f32 0.03125, %v1103_v43 }
 0x3e2   : > { %v1175_v47 = vmul.f32 %v2888_v39, %v1167_v44  ;;  %v1126_v0 = vmul.f32 %v2881_v33, %v1118_v5 }
 0x3e3   : > { %v1055_v48 = vpop.xlane.xlu1 %1054  ;;  %v1151_v52 = vpop.xlane.xlu0 %1150 }
 0x3e4   : > { %v1183_v55 = vadd.f32 %v1175_v47, %v1135_v45  ;;  %v1070_v56 = vmul.f32 0.03125, %v1055_v48  ;;  %v1166_v63 = vmul.f32 0.03125, %v1151_v52 }
 0x3e6   : > { %v3205_v60 = vsub.f32 %v3113_v41, %v1183_v55  ;;  %v1078_v62 = vmul.f32 %v2875_v28, %v1070_v56  ;;  %v1174_v24 = vmul.f32 %v2888_v39, %v1166_v63 }
 0x3e7   : > { %v1013_v58 = vpop.xlane.xlu1 %1012  ;;  %v1061_v2 = vpop.xlane.xlu0 %1060 }
 0x3e8   : > { %v1199_v3 = vmul.f32 %v3205_v60, %v3205_v60  ;;  %v1086_v4 = vadd.f32 %v1078_v62, %v1030_v57  ;;  %v1025_v7 = vmul.f32 0.03125, %v1013_v58  ;;  %v1073_v23 = vmul.f32 0.03125, %v1061_v2 }
 0x3ea   : > { %v1134_v8 = vadd.f32 %v1126_v0, %v1086_v4  ;;  %v1271_v9 = vmul.f32 %v2875_v28, %v1199_v3  ;;  %v1207_v11 = vmul.f32 %v2866_v21, %v1199_v3  ;;  %v1033_v14 = vmul.f32 %v2866_v21, %v1025_v7 }
 0x3eb   : > { %v1109_v41 = vpop.xlane.xlu1 %1108  ;;  %v1011_v10 = vpop.xlane.xlu0 %1010  ;;  %v1081_v17 = vmul.f32 %v2875_v28, %v1073_v23  ;;  %v1335_v20 = vmul.f32 %v2881_v33, %v1199_v3  ;;  %v1399_v35 = vmul.f32 %v2888_v39, %v1199_v3 }
 0x3ec   : > { %v1182_v13 = vadd.f32 %v1174_v24, %v1134_v8  ;;  %v1121_v49 = vmul.f32 0.03125, %v1109_v41  ;;  %1280 = vadd.xlane.f32.xlu1 %v1271_v9  ;;  %1216 = vadd.xlane.f32.xlu0 %v1207_v11  ;;  %v1024_v31 = vmul.f32 0.03125, %v1011_v10  ;;  %v1470_v10 = vld [vmem:[#allocation2 + $0x80] sm:$0xff]  ;;  %v1471_v11 = vld [vmem:[#allocation2 + $0x88] sm:$0xff] }
 0x3ed   : > { %v1089_v29 = vadd.f32 %v1081_v17, %v1033_v14 }
 0x3ee   : > { %v3217_v18 = vsub.f32 %v3115_v34, %v1182_v13  ;;  %v1129_v19 = vmul.f32 %v2881_v33, %v1121_v49  ;;  %v1032_v42 = vmul.f32 %v2866_v21, %v1024_v31  ;;  %v1473_v31 = vld [vmem:[#allocation2 + $0x98] sm:$0xff] }
 0x3ef   : > { %v1157_v22 = vpop.xlane.xlu1 %1156  ;;  %v1107_v25 = vpop.xlane.xlu0 %1106 }
 0x3f0   : > { %v1198_v26 = vmul.f32 %v3217_v18, %v3217_v18  ;;  %v1169_v30 = vmul.f32 0.03125, %v1157_v22  ;;  %1344 = vadd.xlane.f32.xlu1 %v1335_v20  ;;  %v1137_v32 = vadd.f32 %v1129_v19, %v1089_v29  ;;  %v1120_v36 = vmul.f32 0.03125, %v1107_v25 }
 0x3f2   : > { %v1177_v53 = vmul.f32 %v2888_v39, %v1169_v30  ;;  %v1206_v34 = vmul.f32 %v2866_v21, %v1198_v26  ;;  %v1270_v27 = vmul.f32 %v2875_v28, %v1198_v26  ;;  %v1334_v44 = vmul.f32 %v2881_v33, %v1198_v26  ;;  %v1472_v30 = vld [vmem:[#allocation2 + $0x90] sm:$0xff] }
 0x3f3   : > { %v1059_v37 = vpop.xlane.xlu1 %1058  ;;  %v1155_v54 = vpop.xlane.xlu0 %1154  ;;  %v1128_v45 = vmul.f32 %v2881_v33, %v1120_v36  ;;  %v1398_v57 = vmul.f32 %v2888_v39, %v1198_v26 }
 0x3f4   : > { %v1185_v38 = vadd.f32 %v1177_v53, %v1137_v32  ;;  %v1072_v40 = vmul.f32 0.03125, %v1059_v37  ;;  %1408 = vadd.xlane.f32.xlu1 %v1399_v35  ;;  %1214 = vadd.xlane.f32.xlu0 %v1206_v34  ;;  %v1168_v61 = vmul.f32 0.03125, %v1155_v54  ;;  %v2333_v34 = vpack.c.bf16 %v1473_v31, %v1472_v30 }
 0x3f6   : > { %v3229_v1 = vsub.f32 %v3135_v50, %v1185_v38  ;;  %v1080_v43 = vmul.f32 %v2875_v28, %v1072_v40  ;;  %v1176_v50 = vmul.f32 %v2888_v39, %v1168_v61  ;;  %v1474_v61 = vld [vmem:[#allocation2 + $0xa0] sm:$0xff] }
 0x3f7   : > { %v1017_v59 = vpop.xlane.xlu1 %1016  ;;  %v1065_v47 = vpop.xlane.xlu0 %1064 }
 0x3f8   : > { %v1201_v5 = vmul.f32 %v3229_v1, %v3229_v1  ;;  %v1088_v48 = vadd.f32 %v1080_v43, %v1032_v42  ;;  %v1027_v52 = vmul.f32 0.03125, %v1017_v59  ;;  %v1075_v55 = vmul.f32 0.03125, %v1065_v47  ;;  %1278 = vadd.xlane.f32.xlu1 %v1270_v27  ;;  %1342 = vadd.xlane.f32.xlu0 %v1334_v44  ;;  %v1475_v44 = vld [vmem:[#allocation2 + $0xa8] sm:$0xff] }
 0x3fa   : > { %v1136_v56 = vadd.f32 %v1128_v45, %v1088_v48  ;;  %v1209_v62 = vmul.f32 %v2866_v21, %v1201_v5  ;;  %v1035_v2 = vmul.f32 %v2866_v21, %v1027_v52  ;;  %v1083_v3 = vmul.f32 %v2875_v28, %v1075_v55 }
 0x3fb   : > { %v1113_v63 = vpop.xlane.xlu1 %1112  ;;  %v1015_v0 = vpop.xlane.xlu0 %1014  ;;  %v1273_v8 = vmul.f32 %v2875_v28, %v1201_v5  ;;  %v1337_v24 = vmul.f32 %v2881_v33, %v1201_v5  ;;  %v1401_v22 = vmul.f32 %v2888_v39, %v1201_v5 }
 0x3fc   : > { %v1184_v58 = vadd.f32 %v1176_v50, %v1136_v56  ;;  %v1123_v4 = vmul.f32 0.03125, %v1113_v63  ;;  %1406 = vadd.xlane.f32.xlu0 %v1398_v57  ;;  %1220 = vadd.xlane.f32.xlu1 %v1209_v62  ;;  %v1091_v14 = vadd.f32 %v1083_v3, %v1035_v2  ;;  %v1026_v49 = vmul.f32 0.03125, %v1015_v0  ;;  %v1476_v63 = vld [vmem:[#allocation2 + $0xb0] sm:$0xff]  ;;  %v1477_v0 = vld [vmem:[#allocation2 + $0xb8] sm:$0xff] }
 0x3fe   : > { %v3242_v7 = vsub.f32 %v3137_v51, %v1184_v58  ;;  %v1131_v23 = vmul.f32 %v2881_v33, %v1123_v4  ;;  %v2329_v51 = vpack.c.bf16 %v1471_v11, %v1470_v10  ;;  %v1034_v36 = vmul.f32 %v2866_v21, %v1026_v49 }
 0x3ff   : > { %v1161_v9 = vpop.xlane.xlu1 %1160  ;;  %v1111_v41 = vpop.xlane.xlu0 %1110  ;;  %v2341_v4 = vpack.c.bf16 %v1477_v0, %v1476_v63 }
 0x400   : > { %v1200_v13 = vmul.f32 %v3242_v7, %v3242_v7  ;;  %v1171_v17 = vmul.f32 0.03125, %v1161_v9  ;;  %1284 = vadd.xlane.f32.xlu0 %v1273_v8  ;;  %1348 = vadd.xlane.f32.xlu1 %v1337_v24  ;;  %v1139_v19 = vadd.f32 %v1131_v23, %v1091_v14  ;;  %v1122_v53 = vmul.f32 0.03125, %v1111_v41  ;;  %v1478_v14 = vld [vmem:[#allocation2 + $0xc0] sm:$0xff] }
 0x401   : > { %2330 = vmatprep.subr.bf16.mxu0 %v2329_v51 }
 0x402   : > { %v1179_v20 = vmul.f32 %v2888_v39, %v1171_v17  ;;  %v1208_v25 = vmul.f32 %v2866_v21, %v1200_v13  ;;  %v1272_v37 = vmul.f32 %v2875_v28, %v1200_v13  ;;  %2332 = vmatpush3.bf16.msra.mxu0 %v2329_v51  ;;  %v1336_v42 = vmul.f32 %v2881_v33, %v1200_v13  ;;  %v1479_v17 = vld [vmem:[#allocation2 + $0xc8] sm:$0xff] }
 0x403   : > { %v1063_v26 = vpop.xlane.xlu1 %1062  ;;  %v1159_v29 = vpop.xlane.xlu0 %1158  ;;  %2334 = vmatprep.subr.bf16.mxu0 %v2333_v34  ;;  %v1130_v59 = vmul.f32 %v2881_v33, %v1122_v53  ;;  %v1400_v52 = vmul.f32 %v2888_v39, %v1200_v13  ;;  %v1481_v53 = vld [vmem:[#allocation2 + $0xd8] sm:$0xff] }
 0x404   : > { %v1187_v32 = vadd.f32 %v1179_v20, %v1139_v19  ;;  %v1074_v35 = vmul.f32 0.03125, %v1063_v26  ;;  %1412 = vadd.xlane.f32.xlu1 %v1401_v22  ;;  %1218 = vadd.xlane.f32.xlu0 %v1208_v25  ;;  %v1170_v40 = vmul.f32 0.03125, %v1159_v29  ;;  %v2345_v20 = vpack.c.bf16 %v1479_v17, %v1478_v14 }
 0x406   : > { %v3255_v54 = vsub.f32 %v3157_v46, %v1187_v32  ;;  %v1082_v38 = vmul.f32 %v2875_v28, %v1074_v35  ;;  %2336 = vmatpush3.bf16.msra.mxu0 %v2333_v34  ;;  %v2337_v46 = vpack.c.bf16 %v1475_v44, %v1474_v61  ;;  %v1178_v48 = vmul.f32 %v2888_v39, %v1170_v40  ;;  %v1480_v32 = vld [vmem:[#allocation2 + $0xd0] sm:$0xff] }
 0x407   : > { %v1021_v27 = vpop.xlane.xlu1 %1020  ;;  %v1069_v43 = vpop.xlane.xlu0 %1068 }
 0x408   : > { %v1203_v45 = vmul.f32 %v3255_v54, %v3255_v54  ;;  %v1090_v47 = vadd.f32 %v1082_v38, %v1034_v36  ;;  %1282 = vadd.xlane.f32.xlu1 %v1272_v37  ;;  %1346 = vadd.xlane.f32.xlu0 %v1336_v42  ;;  %v1029_v56 = vmul.f32 0.03125, %v1021_v27  ;;  %v1077_v50 = vmul.f32 0.03125, %v1069_v43 }
 0x409   : > { %2338 = vmatprep.subr.bf16.mxu0 %v2337_v46  ;;  %v2349_v42 = vpack.c.bf16 %v1481_v53, %v1480_v32 }
 0x40a   : > { %v1138_v5 = vadd.f32 %v1130_v59, %v1090_v47  ;;  %v1211_v55 = vmul.f32 %v2866_v21, %v1203_v45  ;;  %2340 = vmatpush3.bf16.msra.mxu0 %v2337_v46  ;;  %v1275_v8 = vmul.f32 %v2875_v28, %v1203_v45  ;;  %v1339_v24 = vmul.f32 %v2881_v33, %v1203_v45  ;;  %v1483_v59 = vld [vmem:[#allocation2 + $0xe8] sm:$0xff] }
 0x40b   : > { %v1067_v57 = vpop.xlane.xlu1 %1066  ;;  %v1019_v62 = vpop.xlane.xlu0 %1018  ;;  %v1037_v9 = vmul.f32 %v2866_v21, %v1029_v56  ;;  %v1085_v41 = vmul.f32 %v2875_v28, %v1077_v50  ;;  %2342 = vmatprep.subr.bf16.mxu0 %v2341_v4  ;;  %v1403_v26 = vmul.f32 %v2888_v39, %v1203_v45  ;;  %v1482_v45 = vld [vmem:[#allocation2 + $0xe0] sm:$0xff]  ;;  %v1484_v56 = vld [vmem:[#allocation2 + $0xf0] sm:$0xff]  ;;  %v1485_v50 = vld [vmem:[#allocation2 + $0xf8] sm:$0xff] }
 0x40c   : > { %v1186_v58 = vadd.f32 %v1178_v48, %v1138_v5  ;;  %v1076_v2 = vmul.f32 0.03125, %v1067_v57  ;;  %v1028_v3 = vmul.f32 0.03125, %v1019_v62  ;;  %1410 = vadd.xlane.f32.xlu0 %v1400_v52  ;;  %1224 = vadd.xlane.f32.xlu1 %v1211_v55  ;;  %v2353_v5 = vpack.c.bf16 %v1483_v59, %v1482_v45 }
 0x40d   : > { %v1093_v35 = vadd.f32 %v1085_v41, %v1037_v9  ;;  %v2357_v62 = vpack.c.bf16 %v1485_v50, %v1484_v56 }
 0x40e   : > { %v3266_v23 = vsub.f32 %v3159_v6, %v1186_v58  ;;  %v1084_v10 = vmul.f32 %v2875_v28, %v1076_v2  ;;  %v1036_v6 = vmul.f32 %v2866_v21, %v1028_v3  ;;  %2344 = vmatpush3.bf16.msra.mxu0 %v2341_v4 }
 0x40f   : > { %v1117_v11 = vpop.xlane.xlu1 %1116  ;;  %v1115_v13 = vpop.xlane.xlu0 %1114  ;;  %2346 = vmatprep.subr.bf16.mxu0 %v2345_v20 }
 0x410   : > { %v1202_v49 = vmul.f32 %v3266_v23, %v3266_v23  ;;  %v1125_v51 = vmul.f32 0.03125, %v1117_v11  ;;  %v1124_v19 = vmul.f32 0.03125, %v1115_v13  ;;  %1288 = vadd.xlane.f32.xlu0 %v1275_v8  ;;  %1352 = vadd.xlane.f32.xlu1 %v1339_v24  ;;  %v1092_v34 = vadd.f32 %v1084_v10, %v1036_v6 }
 0x412   : > { %v1133_v22 = vmul.f32 %v2881_v33, %v1125_v51  ;;  %v1132_v25 = vmul.f32 %v2881_v33, %v1124_v19  ;;  %v1210_v29 = vmul.f32 %v2866_v21, %v1202_v49  ;;  %v1274_v38 = vmul.f32 %v2875_v28, %v1202_v49  ;;  %2348 = vmatpush3.bf16.msra.mxu0 %v2345_v20 }
 0x413   : > { %v1165_v30 = vpop.xlane.xlu1 %1164  ;;  %v1163_v31 = vpop.xlane.xlu0 %1162  ;;  %v1338_v40 = vmul.f32 %v2881_v33, %v1202_v49  ;;  %2350 = vmatprep.subr.bf16.mxu0 %v2349_v42  ;;  %v1402_v55 = vmul.f32 %v2888_v39, %v1202_v49 }
 0x414   : > { %v1173_v36 = vmul.f32 0.03125, %v1165_v30  ;;  %v1172_v37 = vmul.f32 0.03125, %v1163_v31  ;;  %1416 = vadd.xlane.f32.xlu1 %v1403_v26  ;;  %1222 = vadd.xlane.f32.xlu0 %v1210_v29  ;;  %v1141_v27 = vadd.f32 %v1133_v22, %v1093_v35  ;;  %v1140_v43 = vadd.f32 %v1132_v25, %v1092_v34 }
 0x416   : > { %v1181_v61 = vmul.f32 %v2888_v39, %v1173_v36  ;;  %v1180_v44 = vmul.f32 %v2888_v39, %v1172_v37  ;;  %2352 = vmatpush3.bf16.msra.mxu0 %v2349_v42 }
 0x417   : > { %2354 = vmatprep.subr.bf16.mxu0 %v2353_v5 }
 0x418   : > { %v1189_v47 = vadd.f32 %v1181_v61, %v1141_v27  ;;  %v1188_v46 = vadd.f32 %v1180_v44, %v1140_v43  ;;  %1286 = vadd.xlane.f32.xlu1 %v1274_v38  ;;  %1350 = vadd.xlane.f32.xlu0 %v1338_v40 }
 0x41a   : > { %v3285_v48 = vsub.f32 %v3174_v15, %v1189_v47  ;;  %v3288_v52 = vsub.f32 %v3181_v16, %v1188_v46  ;;  %2356 = vmatpush3.bf16.msra.mxu0 %v2353_v5 }
 0x41b   : > { %2358 = vmatprep.subr.bf16.mxu0 %v2357_v62 }
 0x41c   : > { %v1205_v57 = vmul.f32 %v3285_v48, %v3285_v48  ;;  %1414 = vadd.xlane.f32.xlu0 %v1402_v55  ;;  %v1204_v63 = vmul.f32 %v3288_v52, %v3288_v52 }
 0x41e   : > { %v1277_v15 = vmul.f32 %v2875_v28, %v1205_v57  ;;  %v1213_v0 = vmul.f32 %v2866_v21, %v1205_v57  ;;  %2360 = vmatpush3.bf16.msra.mxu0 %v2357_v62  ;;  %v1276_v16 = vmul.f32 %v2875_v28, %v1204_v63  ;;  %v1212_v58 = vmul.f32 %v2866_v21, %v1204_v63 }
 0x41f   : > { %v1341_v2 = vmul.f32 %v2881_v33, %v1205_v57  ;;  %v1340_v3 = vmul.f32 %v2881_v33, %v1204_v63  ;;  %v1405_v4 = vmul.f32 %v2888_v39, %v1205_v57  ;;  %v1404_v8 = vmul.f32 %v2888_v39, %v1204_v63 }
 0x420   : > { %1292 = vadd.xlane.f32.xlu0 %v1277_v15  ;;  %1228 = vadd.xlane.f32.xlu1 %v1213_v0 }
 0x424   : > { %1290 = vadd.xlane.f32.xlu1 %v1276_v16  ;;  %1226 = vadd.xlane.f32.xlu0 %v1212_v58 }
 0x428   : > { %1356 = vadd.xlane.f32.xlu1 %v1341_v2  ;;  %1354 = vadd.xlane.f32.xlu0 %v1340_v3 }
 0x42c   : > { %1420 = vadd.xlane.f32.xlu1 %v1405_v4  ;;  %1418 = vadd.xlane.f32.xlu0 %v1404_v8 }
 0x479   : > { %v1281_v24 = vpop.xlane.xlu1 %1280  ;;  %v1217_v9 = vpop.xlane.xlu0 %1216 }
 0x47a   : > { %v1295_v41 = vmul.f32 0.03125, %v1281_v24  ;;  %v1231_v10 = vmul.f32 0.03125, %v1217_v9 }
 0x47c   : > { %v1303_v14 = vadd.f32 1e-05, %v1295_v41  ;;  %v1239_v17 = vadd.f32 1e-05, %v1231_v10 }
 0x47d   : > { %v1345_v11 = vpop.xlane.xlu1 %1344 }
 0x47e   : > { %v1359_v13 = vmul.f32 0.03125, %v1345_v11  ;;  %2529 = vrsqrt.f32 %v1303_v14 }
 0x47f   : > { %2531 = vrsqrt.f32 %v1239_v17 }
 0x480   : > { %v1367_v20 = vadd.f32 1e-05, %v1359_v13 }
 0x481   : > { %v1409_v49 = vpop.xlane.xlu1 %1408  ;;  %v1215_v6 = vpop.xlane.xlu0 %1214 }
 0x482   : > { %v1423_v51 = vmul.f32 0.03125, %v1409_v49  ;;  %v1230_v19 = vmul.f32 0.03125, %v1215_v6  ;;  %2533 = vrsqrt.f32 %v1367_v20 }
 0x484   : > { %v1238_v22 = vadd.f32 1e-05, %v1230_v19  ;;  %v1431_v25 = vadd.f32 1e-05, %v1423_v51 }
 0x485   : > { %v1279_v26 = vpop.xlane.xlu1 %1278  ;;  %v1343_v29 = vpop.xlane.xlu0 %1342 }
 0x486   : > { %v1294_v30 = vmul.f32 0.03125, %v1279_v26  ;;  %v1358_v31 = vmul.f32 0.03125, %v1343_v29  ;;  %2535 = vrsqrt.f32 %v1238_v22 }
 0x487   : > { %2537 = vrsqrt.f32 %v1431_v25 }
 0x488   : > { %v1302_v32 = vadd.f32 1e-05, %v1294_v30  ;;  %v1366_v53 = vadd.f32 1e-05, %v1358_v31  ;;  %v2530_v27 = vpop.eup %2529 }
 0x489   : > { %v1221_v35 = vpop.xlane.xlu1 %1220  ;;  %v1407_v34 = vpop.xlane.xlu0 %1406  ;;  %v1319_v56 = vmul.f32 %v2530_v27, %v2875_v28 }
 0x48a   : > { %2539 = vrsqrt.f32 %v1302_v32  ;;  %v1422_v36 = vmul.f32 0.03125, %v1407_v34  ;;  %v1233_v37 = vmul.f32 0.03125, %v1221_v35  ;;  %v2532_v61 = vpop.eup %2531 }
 0x48b   : > { %2541 = vrsqrt.f32 %v1366_v53  ;;  %v1255_v50 = vmul.f32 %v2532_v61, %v2866_v21 }
 0x48c   : > { %v1430_v38 = vadd.f32 1e-05, %v1422_v36  ;;  %v1241_v45 = vadd.f32 1e-05, %v1233_v37  ;;  %v2534_v47 = vpop.eup %2533 }
 0x48d   : > { %v1349_v40 = vpop.xlane.xlu1 %1348  ;;  %v1285_v42 = vpop.xlane.xlu0 %1284  ;;  %v1383_v2 = vmul.f32 %v2534_v47, %v2881_v33  ;;  %v1327_v41 = vadd.f32 %v1319_v56, %v1255_v50 }
 0x48e   : > { %v1297_v43 = vmul.f32 0.03125, %v1285_v42  ;;  %2543 = vrsqrt.f32 %v1430_v38  ;;  %v1361_v44 = vmul.f32 0.03125, %v1349_v40 }
 0x48f   : > { %v1391_v19 = vadd.f32 %v1383_v2, %v1327_v41 }
 0x490   : > { %v1305_v59 = vadd.f32 1e-05, %v1297_v43  ;;  %v2536_v55 = vpop.eup %2535  ;;  %v1369_v15 = vadd.f32 1e-05, %v1361_v44 }
 0x491   : > { %v1413_v46 = vpop.xlane.xlu1 %1412  ;;  %v1219_v5 = vpop.xlane.xlu0 %1218  ;;  %v1254_v24 = vmul.f32 %v2536_v55, %v2866_v21 }
 0x492   : > { %v1425_v57 = vmul.f32 0.03125, %v1413_v46  ;;  %v1232_v62 = vmul.f32 0.03125, %v1219_v5  ;;  %v2538_v63 = vpop.eup %2537  ;;  %2545 = vrsqrt.f32 %v1305_v59 }
 0x493   : > { %2547 = vrsqrt.f32 %v1241_v45  ;;  %v1447_v13 = vmul.f32 %v2538_v63, %v2888_v39 }
 0x494   : > { %v2540_v0 = vpop.eup %2539  ;;  %v1240_v16 = vadd.f32 1e-05, %v1232_v62  ;;  %v1433_v3 = vadd.f32 1e-05, %v1425_v57  ;;  %2549 = vrsqrt.f32 %v1369_v15 }
 0x495   : > { %v2542_v58 = vpop.eup %2541  ;;  %v1283_v4 = vpop.xlane.xlu1 %1282  ;;  %v1318_v9 = vmul.f32 %v2540_v0, %v2875_v28  ;;  %v1455_v31 = vadd.f32 %v1447_v13, %v1391_v19 }
 0x496   : > { %v1347_v8 = vpop.xlane.xlu0 %1346  ;;  %v1296_v10 = vmul.f32 0.03125, %v1283_v4  ;;  %v1382_v17 = vmul.f32 %v2542_v58, %v2881_v33  ;;  %2551 = vrsqrt.f32 %v1240_v16 }
 0x497   : > { %v1360_v11 = vmul.f32 0.03125, %v1347_v8  ;;  %v1326_v14 = vadd.f32 %v1318_v9, %v1254_v24  ;;  %2553 = vrsqrt.f32 %v1433_v3  ;;  %v1463_v43 = vmul.f32 %v1455_v31, %v3205_v60 }
 0x498   : > { %v1304_v49 = vadd.f32 1e-05, %v1296_v10  ;;  %v2544_v51 = vpop.eup %2543 }
 0x499   : > { %v1368_v6 = vadd.f32 1e-05, %v1360_v11  ;;  %v1225_v20 = vpop.xlane.xlu1 %1224  ;;  %v1390_v25 = vadd.f32 %v1382_v17, %v1326_v14  ;;  %v1446_v30 = vmul.f32 %v2544_v51, %v2888_v39 }
 0x49a   : > { %v1411_v22 = vpop.xlane.xlu0 %1410  ;;  %2555 = vrsqrt.f32 %v1304_v49  ;;  %v1235_v26 = vmul.f32 0.03125, %v1225_v20 }
 0x49b   : > { %v1424_v29 = vmul.f32 0.03125, %v1411_v22  ;;  %2557 = vrsqrt.f32 %v1368_v6  ;;  %v1454_v53 = vadd.f32 %v1446_v30, %v1390_v25 }
 0x49c   : > { %v2546_v35 = vpop.eup %2545  ;;  %v1243_v38 = vadd.f32 1e-05, %v1235_v26 }
 0x49d   : > { %v1432_v32 = vadd.f32 1e-05, %v1424_v29  ;;  %v1353_v34 = vpop.xlane.xlu1 %1352  ;;  %v2548_v37 = vpop.eup %2547  ;;  %v1462_v27 = vmul.f32 %v1454_v53, %v3217_v18  ;;  %v1321_v61 = vmul.f32 %v2546_v35, %v2875_v28 }
 0x49e   : > { %v1289_v36 = vpop.xlane.xlu0 %1288  ;;  %v1363_v40 = vmul.f32 0.03125, %v1353_v34  ;;  %v2550_v45 = vpop.eup %2549  ;;  %v1257_v46 = vmul.f32 %v2548_v37, %v2866_v21 }
 0x49f   : > { %v1299_v42 = vmul.f32 0.03125, %v1289_v36  ;;  %2559 = vrsqrt.f32 %v1432_v32  ;;  %2235 = vmatprep.mubr.f32.mxu0 %v1462_v27  ;;  %v1385_v3 = vmul.f32 %v2550_v45, %v2881_v33 }
 0x4a0   : > { %2236 = vmatmul.mubr.f32.vlgmr.msra.gmra.mrb[8].mxu0 %v1463_v43  ;;  %v2552_v5 = vpop.eup %2551  ;;  %2561 = vrsqrt.f32 %v1243_v38  ;;  %v1371_v55 = vadd.f32 1e-05, %v1363_v40  ;;  %v1329_v18 = vadd.f32 %v1321_v61, %v1257_v46 }
 0x4a1   : > { %v1307_v44 = vadd.f32 1e-05, %v1299_v42  ;;  %v1417_v59 = vpop.xlane.xlu1 %1416  ;;  %v2554_v57 = vpop.eup %2553  ;;  %v1256_v58 = vmul.f32 %v2552_v5, %v2866_v21 }
 0x4a2   : > { %v1223_v47 = vpop.xlane.xlu0 %1222  ;;  %v1427_v56 = vmul.f32 0.03125, %v1417_v59  ;;  %v1449_v24 = vmul.f32 %v2554_v57, %v2888_v39  ;;  %v1393_v10 = vadd.f32 %v1385_v3, %v1329_v18 }
 0x4a3   : > { %v1234_v50 = vmul.f32 0.03125, %v1223_v47  ;;  %2563 = vrsqrt.f32 %v1307_v44 }
 0x4a4   : > { %v2556_v62 = vpop.eup %2555  ;;  %v1435_v60 = vadd.f32 1e-05, %v1427_v56  ;;  %2565 = vrsqrt.f32 %v1371_v55  ;;  %v1457_v19 = vadd.f32 %v1449_v24, %v1393_v10 }
 0x4a5   : > { %v1242_v63 = vadd.f32 1e-05, %v1234_v50  ;;  %v2558_v15 = vpop.eup %2557  ;;  %v1287_v0 = vpop.xlane.xlu1 %1286  ;;  %v1320_v2 = vmul.f32 %v2556_v62, %v2875_v28 }
 0x4a6   : > { %v1351_v16 = vpop.xlane.xlu0 %1350  ;;  %v1298_v4 = vmul.f32 0.03125, %v1287_v0  ;;  %2567 = vrsqrt.f32 %v1435_v60  ;;  %v1384_v41 = vmul.f32 %v2558_v15, %v2881_v33  ;;  %v1465_v35 = vmul.f32 %v1457_v19, %v3229_v1 }
 0x4a7   : > { %v1362_v8 = vmul.f32 0.03125, %v1351_v16  ;;  %v1328_v9 = vadd.f32 %v1320_v2, %v1256_v58  ;;  %2569 = vrsqrt.f32 %v1242_v63 }
 0x4a8   : > { %v1306_v11 = vadd.f32 1e-05, %v1298_v4 }
 0x4a9   : > { %v1370_v13 = vadd.f32 1e-05, %v1362_v8  ;;  %v2560_v14 = vpop.eup %2559  ;;  %v1392_v49 = vadd.f32 %v1384_v41, %v1328_v9 }
 0x4aa   : > { %v1415_v17 = vpop.xlane.xlu0 %1414  ;;  %2571 = vrsqrt.f32 %v1306_v11  ;;  %v1448_v51 = vmul.f32 %v2560_v14, %v2888_v39  ;;  %v2562_v20 = vpop.eup %2561 }
 0x4ab   : > { %v1426_v6 = vmul.f32 0.03125, %v1415_v17  ;;  %2573 = vrsqrt.f32 %v1370_v13  ;;  %v1259_v38 = vmul.f32 %v2562_v20, %v2866_v21 }
 0x4ac   : > { %v1456_v25 = vadd.f32 %v1448_v51, %v1392_v49 }
 0x4ad   : > { %v1434_v22 = vadd.f32 1e-05, %v1426_v6  ;;  %v2564_v26 = vpop.eup %2563  ;;  %v1229_v29 = vpop.xlane.xlu1 %1228 }
 0x4ae   : > { %v1293_v30 = vpop.xlane.xlu0 %1292  ;;  %v1237_v31 = vmul.f32 0.03125, %v1229_v29  ;;  %v1464_v53 = vmul.f32 %v1456_v25, %v3242_v7  ;;  %v1323_v34 = vmul.f32 %v2564_v26, %v2875_v28  ;;  %v2566_v36 = vpop.eup %2565 }
 0x4af   : > { %2575 = vrsqrt.f32 %v1434_v22  ;;  %v1301_v32 = vmul.f32 0.03125, %v1293_v30  ;;  %v1387_v46 = vmul.f32 %v2566_v36, %v2881_v33 }
 0x4b0   : > { %v1245_v37 = vadd.f32 1e-05, %v1237_v31  ;;  %2238 = vmatprep.mubr.f32.mxu0 %v1464_v53  ;;  %v2568_v40 = vpop.eup %2567  ;;  %v1331_v59 = vadd.f32 %v1323_v34, %v1259_v38 }
 0x4b1   : > { %v1309_v42 = vadd.f32 1e-05, %v1301_v32  ;;  %2239 = vmatmul.mubr.f32.gmra.mrb[10].mxu0 %v1465_v35  ;;  %v1291_v27 = vpop.xlane.xlu1 %1290  ;;  %v2570_v61 = vpop.eup %2569  ;;  %v1451_v18 = vmul.f32 %v2568_v40, %v2888_v39 }
 0x4b2   : > { %v1227_v43 = vpop.xlane.xlu0 %1226  ;;  %v1300_v44 = vmul.f32 0.03125, %v1291_v27  ;;  %2577 = vrsqrt.f32 %v1245_v37  ;;  %v1258_v50 = vmul.f32 %v2570_v61, %v2866_v21  ;;  %v1395_v63 = vadd.f32 %v1387_v46, %v1331_v59 }
 0x4b3   : > { %v1236_v45 = vmul.f32 0.03125, %v1227_v43  ;;  %2579 = vrsqrt.f32 %v1309_v42  ;;  %v1488_v61 = vsub.s32 2, %v2857_v12 }
 0x4b4   : > { %v2572_v47 = vpop.eup %2571  ;;  %v1308_v7 = vadd.f32 1e-05, %v1300_v44  ;;  %v1459_v10 = vadd.f32 %v1451_v18, %v1395_v63  ;;  %v3347_v44 = vld [vmem:[%s3528_s3] sm:$0xff] }
 0x4b5   : > { %v1244_v1 = vadd.f32 1e-05, %v1236_v45  ;;  %v2574_v5 = vpop.eup %2573  ;;  %v1357_v55 = vpop.xlane.xlu1 %1356  ;;  %v1322_v57 = vmul.f32 %v2572_v47, %v2875_v28  ;;  %v1489_v45 = vrot.slane %v3347_v44, %v1488_v61  ;;  %v1703_v61 = vld [vmem:[#allocation2 + $0x158] sm:$0xff] }
 0x4b6   : > { %v1355_v56 = vpop.xlane.xlu0 %1354  ;;  %2581 = vrsqrt.f32 %v1308_v7  ;;  %v1365_v62 = vmul.f32 0.03125, %v1357_v55  ;;  %v1386_v0 = vmul.f32 %v2574_v5, %v2881_v33  ;;  %v1467_v6 = vmul.f32 %v1459_v10, %v3255_v54  ;;  %v1696_v10 = vld [vmem:[#allocation2 + $0x120] sm:$0xff] }
 0x4b7   : > { %v1364_v60 = vmul.f32 0.03125, %v1355_v56  ;;  %2583 = vrsqrt.f32 %v1244_v1  ;;  %v1330_v15 = vadd.f32 %v1322_v57, %v1258_v50 }
 0x4b8   : > { %v1373_v58 = vadd.f32 1e-05, %v1365_v62 }
 0x4b9   : > { %v2576_v16 = vpop.eup %2575  ;;  %v1372_v2 = vadd.f32 1e-05, %v1364_v60  ;;  %v1421_v3 = vpop.xlane.xlu1 %1420  ;;  %v1394_v8 = vadd.f32 %v1386_v0, %v1330_v15 }
 0x4ba   : > { %v1419_v4 = vpop.xlane.xlu0 %1418  ;;  %v1450_v24 = vmul.f32 %v2576_v16, %v2888_v39  ;;  %2585 = vrsqrt.f32 %v1373_v58  ;;  %v1429_v9 = vmul.f32 0.03125, %v1421_v3  ;;  %v1692_v3 = vld [vmem:[#allocation2 + $0x100] sm:$0xff] }
 0x4bb   : > { %v1428_v41 = vmul.f32 0.03125, %v1419_v4  ;;  %2587 = vrsqrt.f32 %v1372_v2  ;;  %v1693_v4 = vld [vmem:[#allocation2 + $0x108] sm:$0xff] }
 0x4bc   : > { %v1458_v11 = vadd.f32 %v1450_v24, %v1394_v8  ;;  %v1437_v13 = vadd.f32 1e-05, %v1429_v9  ;;  %v2578_v49 = vpop.eup %2577  ;;  %v1694_v8 = vld [vmem:[#allocation2 + $0x110] sm:$0xff]  ;;  %v2361_v24 = vpack.c.bf16 %v1693_v4, %v1692_v3  ;;  %v1695_v9 = vld [vmem:[#allocation2 + $0x118] sm:$0xff] }
 0x4bd   : > { %v1436_v14 = vadd.f32 1e-05, %v1428_v41  ;;  %v2580_v51 = vpop.eup %2579  ;;  %v1261_v22 = vmul.f32 %v2578_v49, %v2866_v21  ;;  %v2365_v41 = vpack.c.bf16 %v1695_v9, %v1694_v8 }
 0x4be   : > { %v1466_v17 = vmul.f32 %v1458_v11, %v3266_v23  ;;  %2589 = vrsqrt.f32 %v1437_v13  ;;  %v1325_v25 = vmul.f32 %v2580_v51, %v2875_v28  ;;  %v1697_v11 = vld [vmem:[#allocation2 + $0x128] sm:$0xff]  ;;  %2393 = vmatprep.subr.bf16.mxu1 %v2361_v24  ;;  %2362 = vmatprep.subr.bf16.mxu0 %v2361_v24 }
 0x4bf   : > { %2591 = vrsqrt.f32 %v1436_v14  ;;  %2401 = vmatpush3.bf16.msra.mxu1 %v2361_v24  ;;  %2364 = vmatpush3.bf16.msra.mxu0 %v2361_v24  ;;  %v2369_v13 = vpack.c.bf16 %v1697_v11, %v1696_v10  ;;  %v1698_v14 = vld [vmem:[#allocation2 + $0x130] sm:$0xff] }
 0x4c0   : > { %2241 = vmatprep.mubr.f32.mxu0 %v1466_v17  ;;  %v2582_v19 = vpop.eup %2581  ;;  %v1333_v32 = vadd.f32 %v1325_v25, %v1261_v22  ;;  %2394 = vmatprep.subr.bf16.mxu1 %v2365_v41  ;;  %v1699_v17 = vld [vmem:[#allocation2 + $0x138] sm:$0xff] }
 0x4c1   : > { %2242 = vmatmul.mubr.f32.gmra.mrb[12].mxu0 %v1467_v6  ;;  %v2584_v20 = vpop.eup %2583  ;;  %v1324_v30 = vmul.f32 %v2582_v19, %v2875_v28  ;;  %2366 = vmatprep.subr.bf16.mxu0 %v2365_v41  ;;  %v2373_v49 = vpack.c.bf16 %v1699_v17, %v1698_v14 }
 0x4c2   : > { %v1260_v29 = vmul.f32 %v2584_v20, %v2866_v21 }
 0x4c3   : > { %2402 = vmatpush3.bf16.msra.mxu1 %v2365_v41  ;;  %2368 = vmatpush3.bf16.msra.mxu0 %v2365_v41 }
 0x4c4   : > { %v2586_v26 = vpop.eup %2585  ;;  %v1332_v35 = vadd.f32 %v1324_v30, %v1260_v29  ;;  %2395 = vmatprep.subr.bf16.mxu1 %v2369_v13  ;;  %2370 = vmatprep.subr.bf16.mxu0 %v2369_v13 }
 0x4c5   : > { %v2588_v23 = vpop.eup %2587  ;;  %v1389_v31 = vmul.f32 %v2586_v26, %v2881_v33 }
 0x4c6   : > { %v1388_v54 = vmul.f32 %v2588_v23, %v2881_v33 }
 0x4c7   : > { %v1397_v36 = vadd.f32 %v1389_v31, %v1333_v32  ;;  %2403 = vmatpush3.bf16.msra.mxu1 %v2369_v13  ;;  %2372 = vmatpush3.bf16.msra.mxu0 %v2369_v13 }
 0x4c8   : > { %v2590_v53 = vpop.eup %2589  ;;  %v1396_v38 = vadd.f32 %v1388_v54, %v1332_v35  ;;  %2396 = vmatprep.subr.bf16.mxu1 %v2373_v49  ;;  %2374 = vmatprep.subr.bf16.mxu0 %v2373_v49 }
 0x4c9   : > { %v2592_v34 = vpop.eup %2591  ;;  %v1453_v37 = vmul.f32 %v2590_v53, %v2888_v39 }
 0x4ca   : > { %v1452_v40 = vmul.f32 %v2592_v34, %v2888_v39 }
 0x4cb   : > { %v1461_v42 = vadd.f32 %v1453_v37, %v1397_v36  ;;  %2404 = vmatpush3.bf16.msra.mxu1 %v2373_v49  ;;  %2376 = vmatpush3.bf16.msra.mxu0 %v2373_v49 }
 0x4cc   : > { %v1460_v27 = vadd.f32 %v1452_v40, %v1396_v38  ;;  %v1700_v38 = vld [vmem:[#allocation2 + $0x140] sm:$0xff]  ;;  %v1701_v40 = vld [vmem:[#allocation2 + $0x148] sm:$0xff] }
 0x4cd   : > { %v1469_v21 = vmul.f32 %v1461_v42, %v3285_v48 }
 0x4ce   : > { %v1468_v28 = vmul.f32 %v1460_v27, %v3288_v52  ;;  %v2377_v27 = vpack.c.bf16 %v1701_v40, %v1700_v38 }
 0x4d0   : > { %2244 = vmatprep.mubr.f32.mxu0 %v1468_v28  ;;  %2397 = vmatprep.subr.bf16.mxu1 %v2377_v27 }
 0x4d1   : > { %2245 = vmatmul.mubr.f32.gmra.mrb[14].mxu0 %v1469_v21  ;;  %2378 = vmatprep.subr.bf16.mxu0 %v2377_v27 }
 0x4d2   : > { %2405 = vmatpush3.bf16.msra.mxu1 %v2377_v27  ;;  %2380 = vmatpush3.bf16.msra.mxu0 %v2377_v27 }
 0x573   : > { %v2237_v43 = vpop.f32.mrb[8].mxu0 }
 0x574   : > { %v1556_v33 = vpop.f32.mrb[9].mxu0  ;;  %v3358_v18 = vadd.f32 %v2237_v43, %v1489_v45 }
 0x575   : > { %v3355_v50 = vadd.f32 %v1556_v33, %v1489_v45  ;;  %v1702_v33 = vld [vmem:[#allocation2 + $0x150] sm:$0xff] }
 0x576   : > { %v1596_v60 = vmax.f32 %v3358_v18, 0.0 }
 0x577   : > { %v1595_v62 = vmax.f32 %v3355_v50, 0.0 }
 0x584   : > { %v2240_v39 = vpop.f32.mrb[10].mxu0 }
 0x585   : > { %v1572_v59 = vadd.f32 %v2240_v39, %v1489_v45  ;;  %v1566_v47 = vpop.f32.mrb[11].mxu0 }
 0x586   : > { %v1567_v7 = vadd.f32 %v1566_v47, %v1489_v45  ;;  %v1705_v47 = vld [vmem:[#allocation2 + $0x168] sm:$0xff] }
 0x587   : > { %v1598_v48 = vmax.f32 %v1572_v59, 0.0  ;;  %v2381_v59 = vpack.c.bf16 %v1703_v61, %v1702_v33  ;;  %v1710_v61 = vsub.s32 3, %v2857_v12 }
 0x588   : > { %v1597_v1 = vmax.f32 %v1567_v7, 0.0 }
 0x589   : > { %1609 = vadd.xlane.f32.xlu1 %v1598_v48  ;;  %2398 = vmatprep.subr.bf16.mxu1 %v2381_v59 }
 0x58a   : > { %1607 = vadd.xlane.f32.xlu0 %v1597_v1  ;;  %2382 = vmatprep.subr.bf16.mxu0 %v2381_v59 }
 0x58b   : > { %2406 = vmatpush3.bf16.msra.mxu1 %v2381_v59  ;;  %2384 = vmatpush3.bf16.msra.mxu0 %v2381_v59 }
 0x594   : > { %v2243_v52 = vpop.f32.mrb[12].mxu0 }
 0x595   : > { %v3350_v46 = vadd.f32 %v2243_v52, %v1489_v45  ;;  %v1576_v5 = vpop.f32.mrb[13].mxu0 }
 0x596   : > { %v3352_v55 = vadd.f32 %v1576_v5, %v1489_v45 }
 0x597   : > { %v1600_v56 = vmax.f32 %v3350_v46, 0.0 }
 0x598   : > { %v1599_v57 = vmax.f32 %v3352_v55, 0.0 }
 0x599   : > { %1613 = vadd.xlane.f32.xlu1 %v1600_v56 }
 0x59a   : > { %1611 = vadd.xlane.f32.xlu0 %v1599_v57 }
 0x59e   : > { %1603 = vadd.xlane.f32.xlu0 %v1595_v62 }
 0x5a2   : > { %1605 = vadd.xlane.f32.xlu0 %v1596_v60 }
 0x5a4   : > { %v2246_v63 = vpop.f32.mrb[14].mxu0 }
 0x5a5   : > { %v1586_v15 = vpop.f32.mrb[15].mxu0  ;;  %v3368_v16 = vadd.f32 %v2246_v63, %v1489_v45 }
 0x5a6   : > { %v3366_v0 = vadd.f32 %v1586_v15, %v1489_v45  ;;  %v1704_v45 = vld [vmem:[#allocation2 + $0x160] sm:$0xff] }
 0x5a7   : > { %v1602_v2 = vmax.f32 %v3368_v16, 0.0  ;;  %v2385_v7 = vpack.c.bf16 %v1705_v47, %v1704_v45  ;;  %v1711_v45 = vrot.slane %v3347_v44, %v1710_v61 }
 0x5a8   : > { %v1601_v58 = vmax.f32 %v3366_v0, 0.0 }
 0x5a9   : > { %2399 = vmatprep.subr.bf16.mxu1 %v2385_v7  ;;  %2386 = vmatprep.subr.bf16.mxu0 %v2385_v7 }
 0x5aa   : > { %1615 = vadd.xlane.f32.xlu1 %v1601_v58  ;;  %2407 = vmatpush3.bf16.msra.mxu1 %v2385_v7 }
 0x5ab   : > { %2388 = vmatpush3.bf16.msra.mxu0 %v2385_v7 }
 0x5ae   : > { %1617 = vadd.xlane.f32.xlu1 %v1602_v2 }
 0x616   : > { %v1610_v6 = vpop.xlane.xlu1 %1609 }
 0x617   : > { %v1623_v51 = vmul.f32 0.0078125, %v1610_v6  ;;  %v1608_v19 = vpop.xlane.xlu0 %1607 }
 0x618   : > { %v1622_v20 = vmul.f32 0.0078125, %v1608_v19 }
 0x619   : > { %v3376_v22 = vsub.f32 %v1598_v48, %v1623_v51  ;;  %v1706_v48 = vld [vmem:[#allocation2 + $0x170] sm:$0xff] }
 0x61a   : > { %v3378_v25 = vsub.f32 %v1597_v1, %v1622_v20  ;;  %v1707_v1 = vld [vmem:[#allocation2 + $0x178] sm:$0xff] }
 0x61b   : > { %v1639_v26 = vmul.f32 %v3376_v22, %v3376_v22  ;;  %v2389_v46 = vpack.c.bf16 %v1707_v1, %v1706_v48 }
 0x61c   : > { %v1638_v29 = vmul.f32 %v3378_v25, %v3378_v25 }
 0x61d   : > { %1650 = vadd.xlane.f32.xlu1 %v1639_v26  ;;  %2400 = vmatprep.subr.bf16.mxu1 %v2389_v46 }
 0x61e   : > { %1648 = vadd.xlane.f32.xlu0 %v1638_v29  ;;  %2390 = vmatprep.subr.bf16.mxu0 %v2389_v46 }
 0x61f   : > { %2408 = vmatpush3.bf16.msra.mxu1 %v2389_v46  ;;  %2392 = vmatpush3.bf16.msra.mxu0 %v2389_v46 }
 0x626   : > { %v1614_v30 = vpop.xlane.xlu1 %1613 }
 0x627   : > { %v1625_v23 = vmul.f32 0.0078125, %v1614_v30  ;;  %v1612_v31 = vpop.xlane.xlu0 %1611 }
 0x628   : > { %v1624_v54 = vmul.f32 0.0078125, %v1612_v31 }
 0x629   : > { %v3384_v32 = vsub.f32 %v1600_v56, %v1625_v23 }
 0x62a   : > { %v3386_v53 = vsub.f32 %v1599_v57, %v1624_v54 }
 0x62b   : > { %v1604_v35 = vpop.xlane.xlu0 %1603  ;;  %v1641_v34 = vmul.f32 %v3384_v32, %v3384_v32 }
 0x62c   : > { %v1620_v36 = vmul.f32 0.0078125, %v1604_v35  ;;  %v1640_v37 = vmul.f32 %v3386_v53, %v3386_v53 }
 0x62d   : > { %1654 = vadd.xlane.f32.xlu1 %v1641_v34 }
 0x62e   : > { %v3394_v42 = vsub.f32 %v1595_v62, %v1620_v36  ;;  %1652 = vadd.xlane.f32.xlu0 %v1640_v37 }
 0x62f   : > { %v1606_v21 = vpop.xlane.xlu0 %1605 }
 0x630   : > { %v1621_v28 = vmul.f32 0.0078125, %v1606_v21  ;;  %v1636_v43 = vmul.f32 %v3394_v42, %v3394_v42 }
 0x632   : > { %v3400_v39 = vsub.f32 %v1596_v60, %v1621_v28  ;;  %1644 = vadd.xlane.f32.xlu0 %v1636_v43 }
 0x634   : > { %v1637_v52 = vmul.f32 %v3400_v39, %v3400_v39 }
 0x636   : > { %1646 = vadd.xlane.f32.xlu0 %v1637_v52 }
 0x637   : > { %v1616_v5 = vpop.xlane.xlu1 %1615 }
 0x638   : > { %v1626_v55 = vmul.f32 0.0078125, %v1616_v5 }
 0x63a   : > { %v1634_v56 = vsub.f32 %v1601_v58, %v1626_v55 }
 0x63b   : > { %v1618_v50 = vpop.xlane.xlu1 %1617 }
 0x63c   : > { %v1627_v57 = vmul.f32 0.0078125, %v1618_v50  ;;  %v1642_v18 = vmul.f32 %v1634_v56, %v1634_v56 }
 0x63e   : > { %v1635_v62 = vsub.f32 %v1602_v2, %v1627_v57  ;;  %1656 = vadd.xlane.f32.xlu1 %v1642_v18 }
 0x640   : > { %v1643_v60 = vmul.f32 %v1635_v62, %v1635_v62 }
 0x642   : > { %1658 = vadd.xlane.f32.xlu1 %v1643_v60 }
 0x6aa   : > { %v1651_v63 = vpop.xlane.xlu1 %1650 }
 0x6ab   : > { %v1663_v15 = vmul.f32 0.0078125, %v1651_v63  ;;  %v1649_v3 = vpop.xlane.xlu0 %1648 }
 0x6ac   : > { %v1662_v4 = vmul.f32 0.0078125, %v1649_v3 }
 0x6ad   : > { %v1671_v8 = vadd.f32 1e-05, %v1663_v15 }
 0x6ae   : > { %v1670_v24 = vadd.f32 1e-05, %v1662_v4 }
 0x6af   : > { %2593 = vrsqrt.f32 %v1671_v8 }
 0x6b0   : > { %2595 = vrsqrt.f32 %v1670_v24 }
 0x6b9   : > { %v2594_v0 = vpop.eup %2593 }
 0x6ba   : > { %v1655_v58 = vpop.xlane.xlu1 %1654  ;;  %v2596_v9 = vpop.eup %2595  ;;  %v1687_v13 = vmul.f32 %v2594_v0, %v3376_v22 }
 0x6bb   : > { %v1665_v41 = vmul.f32 0.0078125, %v1655_v58  ;;  %v1653_v10 = vpop.xlane.xlu0 %1652  ;;  %v1686_v16 = vmul.f32 %v2596_v9, %v3378_v25 }
 0x6bc   : > { %v1664_v11 = vmul.f32 0.0078125, %v1653_v10 }
 0x6bd   : > { %v1673_v2 = vadd.f32 1e-05, %v1665_v41  ;;  %2282 = vmatprep.mubr.f32.mxu1 %v1686_v16 }
 0x6be   : > { %v1672_v14 = vadd.f32 1e-05, %v1664_v11  ;;  %2283 = vmatmul.mubr.f32.vlgmr.msra.gmra.mrb[8].mxu1 %v1687_v13 }
 0x6bf   : > { %2597 = vrsqrt.f32 %v1673_v2  ;;  %v1645_v17 = vpop.xlane.xlu0 %1644 }
 0x6c0   : > { %2599 = vrsqrt.f32 %v1672_v14  ;;  %v1660_v49 = vmul.f32 0.0078125, %v1645_v17 }
 0x6c2   : > { %v1668_v6 = vadd.f32 1e-05, %v1660_v49 }
 0x6c3   : > { %v1647_v51 = vpop.xlane.xlu0 %1646 }
 0x6c4   : > { %2601 = vrsqrt.f32 %v1668_v6  ;;  %v1661_v19 = vmul.f32 0.0078125, %v1647_v51 }
 0x6c6   : > { %v1669_v20 = vadd.f32 1e-05, %v1661_v19 }
 0x6c8   : > { %2603 = vrsqrt.f32 %v1669_v20 }
 0x6c9   : > { %v2598_v26 = vpop.eup %2597 }
 0x6ca   : > { %v2600_v29 = vpop.eup %2599  ;;  %v1689_v22 = vmul.f32 %v2598_v26, %v3384_v32 }
 0x6cb   : > { %v1688_v25 = vmul.f32 %v2600_v29, %v3386_v53  ;;  %v1657_v30 = vpop.xlane.xlu1 %1656 }
 0x6cc   : > { %v1666_v23 = vmul.f32 0.0078125, %v1657_v30 }
 0x6cd   : > { %2285 = vmatprep.mubr.f32.mxu1 %v1688_v25 }
 0x6ce   : > { %v2602_v31 = vpop.eup %2601  ;;  %2286 = vmatmul.mubr.f32.gmra.mrb[10].mxu1 %v1689_v22  ;;  %v1674_v54 = vadd.f32 1e-05, %v1666_v23 }
 0x6cf   : > { %v1684_v35 = vmul.f32 %v2602_v31, %v3394_v42  ;;  %v1659_v34 = vpop.xlane.xlu1 %1658 }
 0x6d0   : > { %2605 = vrsqrt.f32 %v1674_v54  ;;  %v1667_v36 = vmul.f32 0.0078125, %v1659_v34 }
 0x6d1   : > { %2279 = vmatprep.mubr.f32.mxu0 %v1684_v35 }
 0x6d2   : > { %v2604_v37 = vpop.eup %2603  ;;  %v1675_v38 = vadd.f32 1e-05, %v1667_v36 }
 0x6d3   : > { %v1685_v40 = vmul.f32 %v2604_v37, %v3400_v39 }
 0x6d4   : > { %2607 = vrsqrt.f32 %v1675_v38 }
 0x6d5   : > { %2280 = vmatmul.mubr.f32.vlgmr.msra.gmra.mrb[16].mxu0 %v1685_v40 }
 0x6da   : > { %v2606_v53 = vpop.eup %2605 }
 0x6db   : > { %v1690_v27 = vmul.f32 %v2606_v53, %v1634_v56 }
 0x6dd   : > { %2288 = vmatprep.mubr.f32.mxu1 %v1690_v27 }
 0x6de   : > { %v2608_v32 = vpop.eup %2607 }
 0x6df   : > { %v1691_v21 = vmul.f32 %v2608_v32, %v1635_v62 }
 0x6e1   : > { %2289 = vmatmul.mubr.f32.gmra.mrb[12].mxu1 %v1691_v21 }
 0x791   : > { %v2284_v28 = vpop.f32.mrb[8].mxu1 }
 0x792   : > { %v1788_v43 = vpop.f32.mrb[9].mxu1  ;;  %v1794_v48 = vadd.f32 %v2284_v28, %v1711_v45 }
 0x793   : > { %v1789_v52 = vadd.f32 %v1788_v43, %v1711_v45 }
 0x794   : > { %v1820_v5 = vmax.f32 %v1794_v48, 0.0 }
 0x795   : > { %v1819_v56 = vmax.f32 %v1789_v52, 0.0 }
 0x7a1   : > { %v2287_v33 = vpop.f32.mrb[10].mxu1 }
 0x7a2   : > { %v1798_v42 = vpop.f32.mrb[11].mxu1  ;;  %v1804_v55 = vadd.f32 %v2287_v33, %v1711_v45 }
 0x7a3   : > { %v1799_v50 = vadd.f32 %v1798_v42, %v1711_v45 }
 0x7a4   : > { %v1822_v57 = vmax.f32 %v1804_v55, 0.0 }
 0x7a5   : > { %v1821_v18 = vmax.f32 %v1799_v50, 0.0 }
 0x7a8   : > { %v2281_v59 = vpop.f32.mrb[16].mxu0 }
 0x7a9   : > { %v1784_v47 = vadd.f32 %v2281_v59, %v1711_v45  ;;  %v1778_v7 = vpop.f32.mrb[17].mxu0 }
 0x7aa   : > { %v1779_v39 = vadd.f32 %v1778_v7, %v1711_v45 }
 0x7ab   : > { %v1818_v1 = vmax.f32 %v1784_v47, 0.0 }
 0x7ac   : > { %v1817_v46 = vmax.f32 %v1779_v39, 0.0 }
 0x7ad   : > { %1827 = vadd.xlane.f32.xlu1 %v1818_v1 }
 0x7ae   : > { %1825 = vadd.xlane.f32.xlu0 %v1817_v46 }
 0x7b1   : > { %1831 = vadd.xlane.f32.xlu1 %v1820_v5 }
 0x7b2   : > { %1829 = vadd.xlane.f32.xlu0 %v1819_v56 }
 0x7b4   : > { %v2290_v62 = vpop.f32.mrb[12].mxu1 }
 0x7b5   : > { %1835 = vadd.xlane.f32.xlu1 %v1822_v57  ;;  %v1814_v60 = vadd.f32 %v2290_v62, %v1711_v45  ;;  %v1808_v63 = vpop.f32.mrb[13].mxu1 }
 0x7b6   : > { %1833 = vadd.xlane.f32.xlu0 %v1821_v18  ;;  %v1809_v15 = vadd.f32 %v1808_v63, %v1711_v45 }
 0x7b7   : > { %v1824_v3 = vmax.f32 %v1814_v60, 0.0 }
 0x7b8   : > { %v1823_v4 = vmax.f32 %v1809_v15, 0.0 }
 0x7b9   : > { %1839 = vadd.xlane.f32.xlu1 %v1824_v3 }
 0x7ba   : > { %1837 = vadd.xlane.f32.xlu0 %v1823_v4 }
 0x83a   : > { %v1828_v8 = vpop.xlane.xlu1 %1827 }
 0x83b   : > { %v1842_v24 = vmul.f32 0.0078125, %v1828_v8  ;;  %v1826_v0 = vpop.xlane.xlu0 %1825 }
 0x83c   : > { %v1841_v58 = vmul.f32 0.0078125, %v1826_v0 }
 0x83d   : > { %v3416_v9 = vsub.f32 %v1818_v1, %v1842_v24  ;;  %v1915_v1 = vsub.s32 4, %v2857_v12 }
 0x83e   : > { %v3418_v41 = vsub.f32 %v1817_v46, %v1841_v58  ;;  %v1832_v10 = vpop.xlane.xlu1 %1831 }
 0x83f   : > { %v1844_v11 = vmul.f32 0.0078125, %v1832_v10  ;;  %v1830_v16 = vpop.xlane.xlu0 %1829  ;;  %v1858_v2 = vmul.f32 %v3416_v9, %v3416_v9  ;;  %v1916_v50 = vrot.slane %v3347_v44, %v1915_v1 }
 0x840   : > { %v1843_v13 = vmul.f32 0.0078125, %v1830_v16  ;;  %v1857_v14 = vmul.f32 %v3418_v41, %v3418_v41 }
 0x841   : > { %v3424_v17 = vsub.f32 %v1820_v5, %v1844_v11  ;;  %1867 = vadd.xlane.f32.xlu1 %v1858_v2  ;;  %v1927_v5 = vsub.s32 5, %v2857_v12 }
 0x842   : > { %v3426_v49 = vsub.f32 %v1819_v56, %v1843_v13  ;;  %v1836_v6 = vpop.xlane.xlu1 %1835  ;;  %1865 = vadd.xlane.f32.xlu0 %v1857_v14 }
 0x843   : > { %v1846_v51 = vmul.f32 0.0078125, %v1836_v6  ;;  %v1834_v19 = vpop.xlane.xlu0 %1833  ;;  %v1860_v20 = vmul.f32 %v3424_v17, %v3424_v17  ;;  %v1928_v15 = vrot.slane %v3347_v44, %v1927_v5 }
 0x844   : > { %v1845_v26 = vmul.f32 0.0078125, %v1834_v19  ;;  %v1859_v29 = vmul.f32 %v3426_v49, %v3426_v49 }
 0x845   : > { %v3432_v25 = vsub.f32 %v1822_v57, %v1846_v51  ;;  %1871 = vadd.xlane.f32.xlu1 %v1860_v20 }
 0x846   : > { %v3434_v30 = vsub.f32 %v1821_v18, %v1845_v26  ;;  %1869 = vadd.xlane.f32.xlu0 %v1859_v29  ;;  %v1840_v22 = vpop.xlane.xlu1 %1839 }
 0x847   : > { %v1862_v23 = vmul.f32 %v3432_v25, %v3432_v25  ;;  %v1848_v31 = vmul.f32 0.0078125, %v1840_v22  ;;  %v1838_v54 = vpop.xlane.xlu0 %1837 }
 0x848   : > { %v1861_v35 = vmul.f32 %v3434_v30, %v3434_v30  ;;  %v1847_v34 = vmul.f32 0.0078125, %v1838_v54 }
 0x849   : > { %1875 = vadd.xlane.f32.xlu1 %v1862_v23  ;;  %v3440_v36 = vsub.f32 %v1824_v3, %v1848_v31 }
 0x84a   : > { %1873 = vadd.xlane.f32.xlu0 %v1861_v35  ;;  %v3442_v37 = vsub.f32 %v1823_v4, %v1847_v34 }
 0x84b   : > { %v1864_v38 = vmul.f32 %v3440_v36, %v3440_v36 }
 0x84c   : > { %v1863_v40 = vmul.f32 %v3442_v37, %v3442_v37 }
 0x84d   : > { %1879 = vadd.xlane.f32.xlu1 %v1864_v38 }
 0x84e   : > { %1877 = vadd.xlane.f32.xlu0 %v1863_v40 }
 0x8ce   : > { %v1868_v53 = vpop.xlane.xlu1 %1867 }
 0x8cf   : > { %v1882_v27 = vmul.f32 0.0078125, %v1868_v53  ;;  %v1866_v32 = vpop.xlane.xlu0 %1865 }
 0x8d0   : > { %v1881_v21 = vmul.f32 0.0078125, %v1866_v32 }
 0x8d1   : > { %v1890_v28 = vadd.f32 1e-05, %v1882_v27 }
 0x8d2   : > { %v1889_v43 = vadd.f32 1e-05, %v1881_v21  ;;  %v1872_v33 = vpop.xlane.xlu1 %1871 }
 0x8d3   : > { %2609 = vrsqrt.f32 %v1890_v28  ;;  %v1884_v42 = vmul.f32 0.0078125, %v1872_v33  ;;  %v1870_v61 = vpop.xlane.xlu0 %1869 }
 0x8d4   : > { %2611 = vrsqrt.f32 %v1889_v43  ;;  %v1883_v45 = vmul.f32 0.0078125, %v1870_v61 }
 0x8d5   : > { %v1892_v59 = vadd.f32 1e-05, %v1884_v42 }
 0x8d6   : > { %v1891_v47 = vadd.f32 1e-05, %v1883_v45  ;;  %v1876_v7 = vpop.xlane.xlu1 %1875 }
 0x8d7   : > { %2613 = vrsqrt.f32 %v1892_v59  ;;  %v1886_v39 = vmul.f32 0.0078125, %v1876_v7  ;;  %v1874_v48 = vpop.xlane.xlu0 %1873 }
 0x8d8   : > { %2615 = vrsqrt.f32 %v1891_v47  ;;  %v1885_v52 = vmul.f32 0.0078125, %v1874_v48 }
 0x8d9   : > { %v1894_v46 = vadd.f32 1e-05, %v1886_v39 }
 0x8da   : > { %v1893_v55 = vadd.f32 1e-05, %v1885_v52  ;;  %v1880_v56 = vpop.xlane.xlu1 %1879 }
 0x8db   : > { %2617 = vrsqrt.f32 %v1894_v46  ;;  %v1888_v57 = vmul.f32 0.0078125, %v1880_v56  ;;  %v1878_v18 = vpop.xlane.xlu0 %1877 }
 0x8dc   : > { %2619 = vrsqrt.f32 %v1893_v55  ;;  %v1887_v60 = vmul.f32 0.0078125, %v1878_v18 }
 0x8dd   : > { %v2610_v62 = vpop.eup %2609  ;;  %v1896_v4 = vadd.f32 1e-05, %v1888_v57 }
 0x8de   : > { %v2612_v63 = vpop.eup %2611  ;;  %v1906_v3 = vmul.f32 %v2610_v62, %v3416_v9  ;;  %v1895_v8 = vadd.f32 1e-05, %v1887_v60 }
 0x8df   : > { %v1905_v12 = vmul.f32 %v2612_v63, %v3418_v41  ;;  %2621 = vrsqrt.f32 %v1896_v4 }
 0x8e0   : > { %v1918_v24 = vmul.f32 %v1916_v50, %v1906_v3  ;;  %2623 = vrsqrt.f32 %v1895_v8 }
 0x8e1   : > { %v2614_v0 = vpop.eup %2613  ;;  %v1917_v58 = vmul.f32 %v1916_v50, %v1905_v12 }
 0x8e2   : > { %v2616_v10 = vpop.eup %2615  ;;  %v1930_v11 = vadd.f32 %v1928_v15, %v1918_v24  ;;  %v1908_v16 = vmul.f32 %v2614_v0, %v3424_v17 }
 0x8e3   : > { %v1929_v2 = vadd.f32 %v1928_v15, %v1917_v58  ;;  %v1907_v13 = vmul.f32 %v2616_v10, %v3426_v49 }
 0x8e4   : > { %1938 = vst [vmem:[%s3459_s23 + $0x8] sm:$0xff] %v1930_v11  ;;  %v1920_v44 = vmul.f32 %v1916_v50, %v1908_v16 }
 0x8e5   : > { %v2618_v9 = vpop.eup %2617  ;;  %1937 = vst [vmem:[%s3459_s23] sm:$0xff] %v1929_v2  ;;  %v1919_v41 = vmul.f32 %v1916_v50, %v1907_v13 }
 0x8e6   : > { %v2620_v14 = vpop.eup %2619  ;;  %v1932_v6 = vadd.f32 %v1928_v15, %v1920_v44  ;;  %v1910_v17 = vmul.f32 %v2618_v9, %v3432_v25 }
 0x8e7   : > { %v1931_v49 = vadd.f32 %v1928_v15, %v1919_v41  ;;  %v1909_v51 = vmul.f32 %v2620_v14, %v3434_v30 }
 0x8e8   : > { %1940 = vst [vmem:[%s3459_s23 + $0x18] sm:$0xff] %v1932_v6  ;;  %v1922_v19 = vmul.f32 %v1916_v50, %v1910_v17 }
 0x8e9   : > { %1939 = vst [vmem:[%s3459_s23 + $0x10] sm:$0xff] %v1931_v49  ;;  %v1921_v20 = vmul.f32 %v1916_v50, %v1909_v51  ;;  %v2622_v26 = vpop.eup %2621 }
 0x8ea   : > { %v1934_v29 = vadd.f32 %v1928_v15, %v1922_v19  ;;  %v2624_v22 = vpop.eup %2623  ;;  %v1912_v31 = vmul.f32 %v2622_v26, %v3440_v36 }
 0x8eb   : > { %v1933_v23 = vadd.f32 %v1928_v15, %v1921_v20  ;;  %v1911_v25 = vmul.f32 %v2624_v22, %v3442_v37 }
 0x8ec   : > { %1942 = vst [vmem:[%s3459_s23 + $0x28] sm:$0xff] %v1934_v29  ;;  %v1924_v30 = vmul.f32 %v1916_v50, %v1912_v31 }
 0x8ed   : > { %1941 = vst [vmem:[%s3459_s23 + $0x20] sm:$0xff] %v1933_v23  ;;  %v1923_v54 = vmul.f32 %v1916_v50, %v1911_v25 }
 0x8ee   : > { %v1936_v35 = vadd.f32 %v1928_v15, %v1924_v30 }
 0x8ef   : > { %v1935_v34 = vadd.f32 %v1928_v15, %v1923_v54 }
 0x8f0   : > { %1944 = vst [vmem:[%s3459_s23 + $0x38] sm:$0xff] %v1936_v35 }
 0x8f1   : > { %1943 = vst [vmem:[%s3459_s23 + $0x30] sm:$0xff] %v1935_v34 }
 0x8f2   : > { %2668 = shalt.err (!%p2665_p7)
}
 0x8f3   : > { %s2669_s10 = scalar_lea.hbm %s3476_s5, 1024  ;;  %s2673_s13 = scalar_lea.hbm %s3529_s4, 4096 }
 0x8f4   : > { %p2670_p8 = scmp.ne.s32.totalorder %s3476_s5, %s2669_s10  ;;  %p2674_p1 = scmp.lt.u32.totalorder %s3476_s5, %s3529_s4 }
 0x8f5   : > { %p2675_p0 = scmp.lt.u32.totalorder %s2673_s13, %s2669_s10  ;;  %p2677_p6 = scmp.lt.u32.totalorder %s2669_s10, %s3476_s5 }
 0x8f6   : > { %p2671_p11 = pnand %p2670_p8, %p3540_p9 }
 0x8f7   : > { %p2676_p5 = por %p2675_p0, %p2674_p1 }
 0x8f8   : > { %p2672_p13 = pneg %p2671_p11 }
 0x8f9   : > { %p2678_p10 = por %p2677_p6, %p2676_p5 }
 0x8fb   : > { %p2679_p12 = pnand %p2678_p10, %p2672_p13 }
 0x8fd   : > { %2682 = shalt.err (!%p2679_p12)
}
 0x8fe   : > { %s2729_s22 = smov 128   ;;  %s2730_s23 = smov 8  }
 0x8ff   : > { %2413 = dma.vmem_to_hbm [thread:$0]  (%p3540_p9), %s3478_s30, 1024, %s3476_s5, %s3484_s19, %s2729_s22, %s2729_s22, %s2730_s23  }
 0x900 PF: > { %p2425_p2 = scmp.ge.s32.totalorder %s2721_s18, 2  ;;  %s1974_s28 = sand.u32 1, %s2709_s15  }
 0x901   : > { %p3541_p3 = scmp.ne.s32.totalorder %s3534_s26, 0  ;;  %s1975_s29 = scalar_lea.sflag [#allocation4], %s1974_s28 }
 0x903   : > { %p2420_p4 = pnand %p2425_p2, %p3541_p3 }
 0x905   : > { %2704 = dma.done.wait (!%p2420_p4), %s1975_s29, 1024  }
 0x906   : > { %2706 = vsyncadd (!%p2420_p4), %s1975_s29, 4294966272  ;;  %p15_p7 = scmp.ge.s32.totalorder %s2781_s21, 6   ;;  %s3542_s15 = smov %s2713_s16 }
 0x907   : > { %s3543_s16 = smov %s2717_s17  ;;  %s3544_s17 = smov %s2792_s24 }
 0x908   : > { %s3545_s18 = smov %s2781_s21  ;;  %17 = sbr.rel (!%p15_p7) target bundleno = 4 (0x4), region = 76 }
 0x90f   :  { %1980 = vsyncpa [#allocation3], 1 }
 0x910   :  { %1982 = vsyncpa [#allocation3 + $0x1], 1 }
 0x911   :  { %1983 = vsyncpa [#allocation4], 1 }
 0x912   :  { %1985 = vsyncpa [#allocation4 + $0x1], 1 }

</bundles_post_ra>
